<compile_context>
chip_gen: v6e
topology: v6e:2x2x1
jax: 0.10.0
libtpu: 0.0.40
codegen_flags: <defaults>
</compile_context>

<pallas_src>
import functools
import math

import jax
import jax.numpy as jnp
from jax.experimental import pallas as pl
from jax.experimental.pallas import tpu as pltpu


# --------------------------------------------------------------------------
# In-kernel helpers
# --------------------------------------------------------------------------

def _layernorm(x, eps=1e-6):
    # LayerNorm over last dim, no affine.
    mu = jnp.mean(x, axis=-1, keepdims=True)
    xc = x - mu
    var = jnp.mean(xc * xc, axis=-1, keepdims=True)
    return xc * jax.lax.rsqrt(var + eps)


def _silu(x):
    return x * jax.nn.sigmoid(x)


# --------------------------------------------------------------------------
# Fused kernel: one grid step == one batch element, whole forward pass.
# --------------------------------------------------------------------------

def _fused_kernel(ids_ref, style_ref, sigma_ref,
                  emb_ref,
                  sw1_ref, sb1_ref, sw2_ref, sb2_ref,
                  affw_ref, affb_ref,
                  wqkv_ref, bqkv_ref, wo_ref, bo_ref,
                  tw1_ref, tb1_ref, tw2_ref, tb2_ref,
                  out_ref, *, T, S, D, H, V):
    f32 = jnp.float32
    hd = D // H
    scale = 1.0 / math.sqrt(hd)

    # ---- affine prologue: all 4 (gamma, beta) pairs in one tiny matmul ----
    sig = sigma_ref[0].astype(f32)                                          # (1, G)
    gb = jnp.dot(sig, affw_ref[...], preferred_element_type=f32) + affb_ref[...]  # (1, 8D)

    def gamma_beta(i):
        return (gb[:, (2 * i) * D:(2 * i + 1) * D],
                gb[:, (2 * i + 1) * D:(2 * i + 2) * D])

    # ---- style branch: FFN -> LN -> affine_0 ----
    sty = style_ref[0].astype(f32)                                          # (S, F)
    h = jnp.dot(sty, sw1_ref[...], preferred_element_type=f32) + sb1_ref[...]
    h = _silu(h)
    sty = jnp.dot(h, sw2_ref[...], preferred_element_type=f32) + sb2_ref[...]   # (S, D)
    sty = _layernorm(sty)
    g0, b0 = gamma_beta(0)
    sty = sty * g0 + b0                                                     # style_enc

    # ---- text branch: embedding (one-hot @ table) -> LN -> affine_1 ----
    ids = ids_ref[0]                                                        # (T, 1) int32
    iota = jax.lax.broadcasted_iota(jnp.int32, (T, V), 1)
    onehot = (ids == iota).astype(f32)                                      # (T, V)
    tx = jnp.dot(onehot, emb_ref[...], preferred_element_type=f32)          # (T, D)
    tx = _layernorm(tx)
    g1, b1 = gamma_beta(1)
    tx = tx * g1 + b1

    # ---- cross-attention (query=text, key=value=style), packed QKV ----
    q_full = jnp.dot(tx, wqkv_ref[...], preferred_element_type=f32) + bqkv_ref[...]    # (T, 3D)
    kv_full = jnp.dot(sty, wqkv_ref[...], preferred_element_type=f32) + bqkv_ref[...]  # (S, 3D)
    q = q_full[:, 0:D]
    k = kv_full[:, D:2 * D]
    v = kv_full[:, 2 * D:3 * D]

    heads = []
    for hh in range(H):                                                     # all heads, one grid step
        qh = q[:, hh * hd:(hh + 1) * hd]                                    # (T, hd)
        kh = k[:, hh * hd:(hh + 1) * hd]                                    # (S, hd)
        vh = v[:, hh * hd:(hh + 1) * hd]                                    # (S, hd)
        s = jax.lax.dot_general(qh, kh, (((1,), (1,)), ((), ())),
                                preferred_element_type=f32) * scale         # (T, S)
        s = s - jnp.max(s, axis=-1, keepdims=True)
        p = jnp.exp(s)
        p = p * pl.reciprocal(jnp.sum(p, axis=-1, keepdims=True), approx=True)
        heads.append(jnp.dot(p, vh, preferred_element_type=f32))            # (T, hd)
    attn = jnp.concatenate(heads, axis=-1)                                  # (T, D)
    attn = jnp.dot(attn, wo_ref[...], preferred_element_type=f32) + bo_ref[...]

    # ---- residual + LN + affine_2 ----
    tx = _layernorm(tx + attn)
    g2, b2 = gamma_beta(2)
    tx = tx * g2 + b2

    # ---- text FFN -> LN -> affine_3 ----
    h = jnp.dot(tx, tw1_ref[...], preferred_element_type=f32) + tb1_ref[...]
    h = _silu(h)
    tx = jnp.dot(h, tw2_ref[...], preferred_element_type=f32) + tb2_ref[...]
    tx = _layernorm(tx)
    g3, b3 = gamma_beta(3)
    tx = tx * g3 + b3

    out_ref[0] = tx.astype(out_ref.dtype)                                   # single HBM write


# --------------------------------------------------------------------------
# TextStyleEncoder forward (single pallas_call)
# --------------------------------------------------------------------------

def reshape_up(x, factor):
    B, S, C = x.shape
    return x.reshape(B, S * factor, C // factor)


def text_style_encoder_forward(text_ids, style, sigma, params):
    B, T = text_ids.shape
    V, D = params["emb"].shape
    H = params["mha"]["num_heads"]

    # dropout(0.3) = eval-mode identity; reshape_up is a free row-major reshape.
    style = reshape_up(style, factor=5)                                     # (B, S, F)
    _, S, F = style.shape
    G = sigma.shape[-1]
    sigma3 = sigma.reshape(B, 1, G)
    ids3 = text_ids.reshape(B, T, 1).astype(jnp.int32)

    mha = params["mha"]
    wqkv = jnp.concatenate([mha["wq"], mha["wk"], mha["wv"]], axis=1)       # (D, 3D)
    bqkv = jnp.concatenate([mha["bq"], mha["bk"], mha["bv"]]).reshape(1, 3 * D)

    aff = [params["affine_%d" % i] for i in range(4)]
    affw = jnp.concatenate(sum([[a["wg"], a["wb"]] for a in aff], []), axis=1)   # (G, 8D)
    affb = jnp.concatenate(sum([[a["bg"], a["bb"]] for a in aff], [])).reshape(1, 8 * D)

    sffn, tffn = params["style_ffn"], params["text_ffn"]

    def batched(shape):                      # one batch element per grid step
        n = len(shape)
        return pl.BlockSpec((1,) + tuple(shape[1:]),
                            lambda b, _n=n: (b,) + (0,) * (_n - 1))

    def full(shape):                         # weights: same block every step -> DMA'd once
        n = len(shape)
        return pl.BlockSpec(tuple(shape), lambda b, _n=n: (0,) * _n)

    args = (ids3, style, sigma3,
            params["emb"],
            sffn["w1"], sffn["b1"].reshape(1, -1), sffn["w2"], sffn["b2"].reshape(1, -1),
            affw, affb,
            wqkv, bqkv, mha["wo"], mha["bo"].reshape(1, -1),
            tffn["w1"], tffn["b1"].reshape(1, -1), tffn["w2"], tffn["b2"].reshape(1, -1))

    in_specs = ([batched(ids3.shape), batched(style.shape), batched(sigma3.shape)]
                + [full(a.shape) for a in args[3:]])

    out = pl.pallas_call(
        functools.partial(_fused_kernel, T=T, S=S, D=D, H=H, V=V),
        grid=(B,),
        in_specs=in_specs,
        out_specs=pl.BlockSpec((1, T, D), lambda b: (b, 0, 0)),
        out_shape=jax.ShapeDtypeStruct((B, T, D), jnp.float32),
        compiler_params=pltpu.CompilerParams(
            dimension_semantics=("parallel",)),     # v7x: one batch element per TensorCore
    )(*args)
    return out


# --------------------------------------------------------------------------
# Deterministic synthetic parameters
# --------------------------------------------------------------------------

def init_params(key, in_features, d_model, vocab_size, hidden_size):
    keys = iter(jax.random.split(key, 64))

    def w(shape, scale=0.02):
        return (scale * jax.random.normal(next(keys), shape)).astype(jnp.float32)

    def affine(g, d):
        return dict(wg=w((g, d)), bg=jnp.ones((d,), jnp.float32),   # gamma bias = ones
                    wb=w((g, d)), bb=jnp.zeros((d,), jnp.float32))

    G = in_features // 8
    return {
        "style_ffn": dict(w1=w((in_features, hidden_size)),
                          b1=jnp.zeros((hidden_size,), jnp.float32),
                          w2=w((hidden_size, d_model)),
                          b2=jnp.zeros((d_model,), jnp.float32)),
        "affine_0": affine(G, d_model),
        "emb": w((vocab_size, d_model), scale=1.0),
        "affine_1": affine(G, d_model),
        "mha": dict(num_heads=8,
                    wq=w((d_model, d_model)), bq=jnp.zeros((d_model,), jnp.float32),
                    wk=w((d_model, d_model)), bk=jnp.zeros((d_model,), jnp.float32),
                    wv=w((d_model, d_model)), bv=jnp.zeros((d_model,), jnp.float32),
                    wo=w((d_model, d_model)), bo=jnp.zeros((d_model,), jnp.float32)),
        "affine_2": affine(G, d_model),
        "text_ffn": dict(w1=w((d_model, 2 * d_model)),
                         b1=jnp.zeros((2 * d_model,), jnp.float32),
                         w2=w((2 * d_model, d_model)),
                         b2=jnp.zeros((d_model,), jnp.float32)),
        "affine_3": affine(G, d_model),
    }


if __name__ == "__main__":
    B = 2
    in_features = 32          # post-reshape_up style feature dim
    d_model = 32              # divisible by 8 heads
    vocab_size = 73
    hidden_size = 64
    T = 8                     # text sequence length
    S_style = 4               # style sequence length before reshape_up(5)

    key = jax.random.PRNGKey(0)
    k_text, k_style, k_sigma, k_params = jax.random.split(key, 4)

    text = jax.random.randint(k_text, (B, T), 0, vocab_size, dtype=jnp.int32)
    style = jax.random.normal(k_style, (B, S_style, in_features * 5), dtype=jnp.float32)
    sigma = jax.random.uniform(k_sigma, (B, 1, in_features // 8), dtype=jnp.float32)

    params = init_params(k_params, in_features, d_model, vocab_size, hidden_size)

    out = text_style_encoder_forward(text, style, sigma, params)
    out = jax.block_until_ready(out)
    assert out.shape == (B, T, d_model), out.shape
    assert bool(jnp.all(jnp.isfinite(out)))
    print("KERNEL_OK")
</pallas_src>

<mosaic_0001>
module attributes {stable_mosaic.version = 11 : i64} {
  func.func @_fused_kernel(%arg0: i32, %arg1: memref<1x8x1xi32, #tpu.memory_space<vmem>>, %arg2: memref<1x20x32xf32, #tpu.memory_space<vmem>>, %arg3: memref<1x1x4xf32, #tpu.memory_space<vmem>>, %arg4: memref<73x32xf32, #tpu.memory_space<vmem>>, %arg5: memref<32x64xf32, #tpu.memory_space<vmem>>, %arg6: memref<1x64xf32, #tpu.memory_space<vmem>>, %arg7: memref<64x32xf32, #tpu.memory_space<vmem>>, %arg8: memref<1x32xf32, #tpu.memory_space<vmem>>, %arg9: memref<4x256xf32, #tpu.memory_space<vmem>>, %arg10: memref<1x256xf32, #tpu.memory_space<vmem>>, %arg11: memref<32x96xf32, #tpu.memory_space<vmem>>, %arg12: memref<1x96xf32, #tpu.memory_space<vmem>>, %arg13: memref<32x32xf32, #tpu.memory_space<vmem>>, %arg14: memref<1x32xf32, #tpu.memory_space<vmem>>, %arg15: memref<32x64xf32, #tpu.memory_space<vmem>>, %arg16: memref<1x64xf32, #tpu.memory_space<vmem>>, %arg17: memref<64x32xf32, #tpu.memory_space<vmem>>, %arg18: memref<1x32xf32, #tpu.memory_space<vmem>>, %arg19: memref<1x8x32xf32, #tpu.memory_space<vmem>>) attributes {dimension_semantics = [#tpu.dimension_semantics<parallel>], iteration_bounds = array<i64: 2>, scalar_prefetch = 0 : i64, scratch_operands = 0 : i64, tpu.core_type = #tpu.core_type<tc>, window_params = [{transform_indices = @transform_0, window_bounds = array<i64: 1, 8, 1>}, {transform_indices = @transform_1, window_bounds = array<i64: 1, 20, 32>}, {transform_indices = @transform_2, window_bounds = array<i64: 1, 1, 4>}, {pipeline_mode = #tpu.pipeline_mode<synchronous>, transform_indices = @transform_3, window_bounds = array<i64: 73, 32>}, {pipeline_mode = #tpu.pipeline_mode<synchronous>, transform_indices = @transform_4, window_bounds = array<i64: 32, 64>}, {pipeline_mode = #tpu.pipeline_mode<synchronous>, transform_indices = @transform_5, window_bounds = array<i64: 1, 64>}, {pipeline_mode = #tpu.pipeline_mode<synchronous>, transform_indices = @transform_6, window_bounds = array<i64: 64, 32>}, {pipeline_mode = #tpu.pipeline_mode<synchronous>, transform_indices = @transform_7, window_bounds = array<i64: 1, 32>}, {pipeline_mode = #tpu.pipeline_mode<synchronous>, transform_indices = @transform_8, window_bounds = array<i64: 4, 256>}, {pipeline_mode = #tpu.pipeline_mode<synchronous>, transform_indices = @transform_9, window_bounds = array<i64: 1, 256>}, {pipeline_mode = #tpu.pipeline_mode<synchronous>, transform_indices = @transform_10, window_bounds = array<i64: 32, 96>}, {pipeline_mode = #tpu.pipeline_mode<synchronous>, transform_indices = @transform_11, window_bounds = array<i64: 1, 96>}, {pipeline_mode = #tpu.pipeline_mode<synchronous>, transform_indices = @transform_12, window_bounds = array<i64: 32, 32>}, {pipeline_mode = #tpu.pipeline_mode<synchronous>, transform_indices = @transform_13, window_bounds = array<i64: 1, 32>}, {pipeline_mode = #tpu.pipeline_mode<synchronous>, transform_indices = @transform_14, window_bounds = array<i64: 32, 64>}, {pipeline_mode = #tpu.pipeline_mode<synchronous>, transform_indices = @transform_15, window_bounds = array<i64: 1, 64>}, {pipeline_mode = #tpu.pipeline_mode<synchronous>, transform_indices = @transform_16, window_bounds = array<i64: 64, 32>}, {pipeline_mode = #tpu.pipeline_mode<synchronous>, transform_indices = @transform_17, window_bounds = array<i64: 1, 32>}, {transform_indices = @transform_18, window_bounds = array<i64: 1, 8, 32>}]} {
    %c0 = arith.constant 0 : index
    %c0_0 = arith.constant 0 : index
    %c0_1 = arith.constant 0 : index
    %0 = vector.load %arg3[%c0, %c0_0, %c0_1] : memref<1x1x4xf32, #tpu.memory_space<vmem>>, vector<1x1x4xf32>
    %1 = vector.shape_cast %0 : vector<1x1x4xf32> to vector<1x4xf32>
    %c0_2 = arith.constant 0 : index
    %c0_3 = arith.constant 0 : index
    %2 = vector.load %arg9[%c0_2, %c0_3] : memref<4x256xf32, #tpu.memory_space<vmem>>, vector<4x256xf32>
    %cst = arith.constant dense<0.000000e+00> : vector<1x256xf32>
    %3 = tpu.matmul %1, %2, %cst {dimension_numbers = #tpu.dot_dimension_numbers<[1], [0], [0], [1], [0, 0, 1, 1], [], []>} : vector<1x4xf32>, vector<4x256xf32>, vector<1x256xf32> -> vector<1x256xf32>
    %c0_4 = arith.constant 0 : index
    %c0_5 = arith.constant 0 : index
    %4 = vector.load %arg10[%c0_4, %c0_5] : memref<1x256xf32, #tpu.memory_space<vmem>>, vector<1x256xf32>
    %5 = arith.addf %3, %4 : vector<1x256xf32>
    %c0_6 = arith.constant 0 : index
    %c0_7 = arith.constant 0 : index
    %c0_8 = arith.constant 0 : index
    %6 = vector.load %arg2[%c0_6, %c0_7, %c0_8] : memref<1x20x32xf32, #tpu.memory_space<vmem>>, vector<1x20x32xf32>
    %7 = vector.shape_cast %6 : vector<1x20x32xf32> to vector<20x32xf32>
    %c0_9 = arith.constant 0 : index
    %c0_10 = arith.constant 0 : index
    %8 = vector.load %arg5[%c0_9, %c0_10] : memref<32x64xf32, #tpu.memory_space<vmem>>, vector<32x64xf32>
    %cst_11 = arith.constant dense<0.000000e+00> : vector<20x64xf32>
    %9 = tpu.matmul %7, %8, %cst_11 {dimension_numbers = #tpu.dot_dimension_numbers<[1], [0], [0], [1], [0, 0, 1, 1], [], []>} : vector<20x32xf32>, vector<32x64xf32>, vector<20x64xf32> -> vector<20x64xf32>
    %c0_12 = arith.constant 0 : index
    %c0_13 = arith.constant 0 : index
    %10 = vector.load %arg6[%c0_12, %c0_13] : memref<1x64xf32, #tpu.memory_space<vmem>>, vector<1x64xf32>
    %11 = vector.broadcast %10 : vector<1x64xf32> to vector<20x64xf32>
    %12 = arith.addf %9, %11 : vector<20x64xf32>
    %13 = arith.negf %12 : vector<20x64xf32>
    %14 = math.exp %13 : vector<20x64xf32>
    %cst_14 = arith.constant 1.000000e+00 : f32
    %15 = vector.broadcast %cst_14 : f32 to vector<20x64xf32>
    %16 = arith.addf %15, %14 : vector<20x64xf32>
    %17 = arith.divf %15, %16 : vector<20x64xf32>
    %18 = arith.mulf %12, %17 : vector<20x64xf32>
    %c0_15 = arith.constant 0 : index
    %c0_16 = arith.constant 0 : index
    %19 = vector.load %arg7[%c0_15, %c0_16] : memref<64x32xf32, #tpu.memory_space<vmem>>, vector<64x32xf32>
    %cst_17 = arith.constant dense<0.000000e+00> : vector<20x32xf32>
    %20 = tpu.matmul %18, %19, %cst_17 {dimension_numbers = #tpu.dot_dimension_numbers<[1], [0], [0], [1], [0, 0, 1, 1], [], []>} : vector<20x64xf32>, vector<64x32xf32>, vector<20x32xf32> -> vector<20x32xf32>
    %c0_18 = arith.constant 0 : index
    %c0_19 = arith.constant 0 : index
    %21 = vector.load %arg8[%c0_18, %c0_19] : memref<1x32xf32, #tpu.memory_space<vmem>>, vector<1x32xf32>
    %22 = vector.broadcast %21 : vector<1x32xf32> to vector<20x32xf32>
    %23 = arith.addf %20, %22 : vector<20x32xf32>
    %cst_20 = arith.constant dense<0.000000e+00> : vector<20xf32>
    %24 = vector.multi_reduction <add>, %23, %cst_20 [1] : vector<20x32xf32> to vector<20xf32>
    %25 = vector.shape_cast %24 : vector<20xf32> to vector<20x1xf32>
    %cst_21 = arith.constant 3.200000e+01 : f32
    %26 = vector.broadcast %cst_21 : f32 to vector<20x1xf32>
    %27 = arith.divf %25, %26 : vector<20x1xf32>
    %28 = vector.broadcast %27 : vector<20x1xf32> to vector<20x32xf32>
    %29 = arith.subf %23, %28 : vector<20x32xf32>
    %30 = arith.mulf %29, %29 : vector<20x32xf32>
    %cst_22 = arith.constant dense<0.000000e+00> : vector<20xf32>
    %31 = vector.multi_reduction <add>, %30, %cst_22 [1] : vector<20x32xf32> to vector<20xf32>
    %32 = vector.shape_cast %31 : vector<20xf32> to vector<20x1xf32>
    %cst_23 = arith.constant 3.200000e+01 : f32
    %33 = vector.broadcast %cst_23 : f32 to vector<20x1xf32>
    %34 = arith.divf %32, %33 : vector<20x1xf32>
    %cst_24 = arith.constant 9.99999997E-7 : f32
    %35 = vector.broadcast %cst_24 : f32 to vector<20x1xf32>
    %36 = arith.addf %34, %35 : vector<20x1xf32>
    %37 = math.rsqrt %36 : vector<20x1xf32>
    %38 = vector.broadcast %37 : vector<20x1xf32> to vector<20x32xf32>
    %39 = arith.mulf %29, %38 : vector<20x32xf32>
    %40 = vector.extract_strided_slice %5 {offsets = [0, 0], sizes = [1, 32], strides = [1, 1]} : vector<1x256xf32> to vector<1x32xf32>
    %41 = vector.extract_strided_slice %5 {offsets = [0, 32], sizes = [1, 32], strides = [1, 1]} : vector<1x256xf32> to vector<1x32xf32>
    %42 = vector.broadcast %40 : vector<1x32xf32> to vector<20x32xf32>
    %43 = arith.mulf %39, %42 : vector<20x32xf32>
    %44 = vector.broadcast %41 : vector<1x32xf32> to vector<20x32xf32>
    %45 = arith.addf %43, %44 : vector<20x32xf32>
    %c0_25 = arith.constant 0 : index
    %c0_26 = arith.constant 0 : index
    %c0_27 = arith.constant 0 : index
    %46 = vector.load %arg1[%c0_25, %c0_26, %c0_27] : memref<1x8x1xi32, #tpu.memory_space<vmem>>, vector<1x8x1xi32>
    %47 = vector.shape_cast %46 : vector<1x8x1xi32> to vector<8x1xi32>
    %48 = tpu.iota {dimensions = array<i32: 1>} : vector<8x73xi32>
    %49 = vector.broadcast %47 : vector<8x1xi32> to vector<8x73xi32>
    %50 = arith.cmpi eq, %49, %48 : vector<8x73xi32>
    %51 = arith.extui %50 : vector<8x73xi1> to vector<8x73xi32>
    %52 = arith.sitofp %51 : vector<8x73xi32> to vector<8x73xf32>
    %c0_28 = arith.constant 0 : index
    %c0_29 = arith.constant 0 : index
    %53 = vector.load %arg4[%c0_28, %c0_29] : memref<73x32xf32, #tpu.memory_space<vmem>>, vector<73x32xf32>
    %cst_30 = arith.constant dense<0.000000e+00> : vector<8x32xf32>
    %54 = tpu.matmul %52, %53, %cst_30 {dimension_numbers = #tpu.dot_dimension_numbers<[1], [0], [0], [1], [0, 0, 1, 1], [], []>} : vector<8x73xf32>, vector<73x32xf32>, vector<8x32xf32> -> vector<8x32xf32>
    %cst_31 = arith.constant dense<0.000000e+00> : vector<8xf32>
    %55 = vector.multi_reduction <add>, %54, %cst_31 [1] : vector<8x32xf32> to vector<8xf32>
    %56 = vector.shape_cast %55 : vector<8xf32> to vector<8x1xf32>
    %cst_32 = arith.constant 3.200000e+01 : f32
    %57 = vector.broadcast %cst_32 : f32 to vector<8x1xf32>
    %58 = arith.divf %56, %57 : vector<8x1xf32>
    %59 = vector.broadcast %58 : vector<8x1xf32> to vector<8x32xf32>
    %60 = arith.subf %54, %59 : vector<8x32xf32>
    %61 = arith.mulf %60, %60 : vector<8x32xf32>
    %cst_33 = arith.constant dense<0.000000e+00> : vector<8xf32>
    %62 = vector.multi_reduction <add>, %61, %cst_33 [1] : vector<8x32xf32> to vector<8xf32>
    %63 = vector.shape_cast %62 : vector<8xf32> to vector<8x1xf32>
    %cst_34 = arith.constant 3.200000e+01 : f32
    %64 = vector.broadcast %cst_34 : f32 to vector<8x1xf32>
    %65 = arith.divf %63, %64 : vector<8x1xf32>
    %cst_35 = arith.constant 9.99999997E-7 : f32
    %66 = vector.broadcast %cst_35 : f32 to vector<8x1xf32>
    %67 = arith.addf %65, %66 : vector<8x1xf32>
    %68 = math.rsqrt %67 : vector<8x1xf32>
    %69 = vector.broadcast %68 : vector<8x1xf32> to vector<8x32xf32>
    %70 = arith.mulf %60, %69 : vector<8x32xf32>
    %71 = vector.extract_strided_slice %5 {offsets = [0, 64], sizes = [1, 32], strides = [1, 1]} : vector<1x256xf32> to vector<1x32xf32>
    %72 = vector.extract_strided_slice %5 {offsets = [0, 96], sizes = [1, 32], strides = [1, 1]} : vector<1x256xf32> to vector<1x32xf32>
    %73 = vector.broadcast %71 : vector<1x32xf32> to vector<8x32xf32>
    %74 = arith.mulf %70, %73 : vector<8x32xf32>
    %75 = vector.broadcast %72 : vector<1x32xf32> to vector<8x32xf32>
    %76 = arith.addf %74, %75 : vector<8x32xf32>
    %c0_36 = arith.constant 0 : index
    %c0_37 = arith.constant 0 : index
    %77 = vector.load %arg11[%c0_36, %c0_37] : memref<32x96xf32, #tpu.memory_space<vmem>>, vector<32x96xf32>
    %cst_38 = arith.constant dense<0.000000e+00> : vector<8x96xf32>
    %78 = tpu.matmul %76, %77, %cst_38 {dimension_numbers = #tpu.dot_dimension_numbers<[1], [0], [0], [1], [0, 0, 1, 1], [], []>} : vector<8x32xf32>, vector<32x96xf32>, vector<8x96xf32> -> vector<8x96xf32>
    %c0_39 = arith.constant 0 : index
    %c0_40 = arith.constant 0 : index
    %79 = vector.load %arg12[%c0_39, %c0_40] : memref<1x96xf32, #tpu.memory_space<vmem>>, vector<1x96xf32>
    %80 = vector.broadcast %79 : vector<1x96xf32> to vector<8x96xf32>
    %81 = arith.addf %78, %80 : vector<8x96xf32>
    %c0_41 = arith.constant 0 : index
    %c0_42 = arith.constant 0 : index
    %82 = vector.load %arg11[%c0_41, %c0_42] : memref<32x96xf32, #tpu.memory_space<vmem>>, vector<32x96xf32>
    %cst_43 = arith.constant dense<0.000000e+00> : vector<20x96xf32>
    %83 = tpu.matmul %45, %82, %cst_43 {dimension_numbers = #tpu.dot_dimension_numbers<[1], [0], [0], [1], [0, 0, 1, 1], [], []>} : vector<20x32xf32>, vector<32x96xf32>, vector<20x96xf32> -> vector<20x96xf32>
    %c0_44 = arith.constant 0 : index
    %c0_45 = arith.constant 0 : index
    %84 = vector.load %arg12[%c0_44, %c0_45] : memref<1x96xf32, #tpu.memory_space<vmem>>, vector<1x96xf32>
    %85 = vector.broadcast %84 : vector<1x96xf32> to vector<20x96xf32>
    %86 = arith.addf %83, %85 : vector<20x96xf32>
    %87 = vector.extract_strided_slice %81 {offsets = [0, 0], sizes = [8, 32], strides = [1, 1]} : vector<8x96xf32> to vector<8x32xf32>
    %88 = vector.extract_strided_slice %86 {offsets = [0, 32], sizes = [20, 32], strides = [1, 1]} : vector<20x96xf32> to vector<20x32xf32>
    %89 = vector.extract_strided_slice %86 {offsets = [0, 64], sizes = [20, 32], strides = [1, 1]} : vector<20x96xf32> to vector<20x32xf32>
    %90 = vector.extract_strided_slice %87 {offsets = [0, 0], sizes = [8, 4], strides = [1, 1]} : vector<8x32xf32> to vector<8x4xf32>
    %91 = vector.extract_strided_slice %88 {offsets = [0, 0], sizes = [20, 4], strides = [1, 1]} : vector<20x32xf32> to vector<20x4xf32>
    %92 = vector.extract_strided_slice %89 {offsets = [0, 0], sizes = [20, 4], strides = [1, 1]} : vector<20x32xf32> to vector<20x4xf32>
    %cst_46 = arith.constant dense<0.000000e+00> : vector<8x20xf32>
    %93 = tpu.matmul %90, %91, %cst_46 {dimension_numbers = #tpu.dot_dimension_numbers<[1], [1], [0], [0], [0, 0, 1, 0], [], []>} : vector<8x4xf32>, vector<20x4xf32>, vector<8x20xf32> -> vector<8x20xf32>
    %cst_47 = arith.constant 5.000000e-01 : f32
    %94 = vector.broadcast %cst_47 : f32 to vector<8x20xf32>
    %95 = arith.mulf %93, %94 : vector<8x20xf32>
    %cst_48 = arith.constant dense<0xFF800000> : vector<8xf32>
    %96 = vector.multi_reduction <maximumf>, %95, %cst_48 [1] : vector<8x20xf32> to vector<8xf32>
    %97 = vector.shape_cast %96 : vector<8xf32> to vector<8x1xf32>
    %98 = vector.broadcast %97 : vector<8x1xf32> to vector<8x20xf32>
    %99 = arith.subf %95, %98 : vector<8x20xf32>
    %100 = math.exp %99 : vector<8x20xf32>
    %cst_49 = arith.constant dense<0.000000e+00> : vector<8xf32>
    %101 = vector.multi_reduction <add>, %100, %cst_49 [1] : vector<8x20xf32> to vector<8xf32>
    %102 = vector.shape_cast %101 : vector<8xf32> to vector<8x1xf32>
    %103 = tpu.reciprocal %102 {approx = true} : vector<8x1xf32> -> vector<8x1xf32>
    %104 = vector.broadcast %103 : vector<8x1xf32> to vector<8x20xf32>
    %105 = arith.mulf %100, %104 : vector<8x20xf32>
    %cst_50 = arith.constant dense<0.000000e+00> : vector<8x4xf32>
    %106 = tpu.matmul %105, %92, %cst_50 {dimension_numbers = #tpu.dot_dimension_numbers<[1], [0], [0], [1], [0, 0, 1, 1], [], []>} : vector<8x20xf32>, vector<20x4xf32>, vector<8x4xf32> -> vector<8x4xf32>
    %107 = vector.extract_strided_slice %87 {offsets = [0, 4], sizes = [8, 4], strides = [1, 1]} : vector<8x32xf32> to vector<8x4xf32>
    %108 = vector.extract_strided_slice %88 {offsets = [0, 4], sizes = [20, 4], strides = [1, 1]} : vector<20x32xf32> to vector<20x4xf32>
    %109 = vector.extract_strided_slice %89 {offsets = [0, 4], sizes = [20, 4], strides = [1, 1]} : vector<20x32xf32> to vector<20x4xf32>
    %cst_51 = arith.constant dense<0.000000e+00> : vector<8x20xf32>
    %110 = tpu.matmul %107, %108, %cst_51 {dimension_numbers = #tpu.dot_dimension_numbers<[1], [1], [0], [0], [0, 0, 1, 0], [], []>} : vector<8x4xf32>, vector<20x4xf32>, vector<8x20xf32> -> vector<8x20xf32>
    %cst_52 = arith.constant 5.000000e-01 : f32
    %111 = vector.broadcast %cst_52 : f32 to vector<8x20xf32>
    %112 = arith.mulf %110, %111 : vector<8x20xf32>
    %cst_53 = arith.constant dense<0xFF800000> : vector<8xf32>
    %113 = vector.multi_reduction <maximumf>, %112, %cst_53 [1] : vector<8x20xf32> to vector<8xf32>
    %114 = vector.shape_cast %113 : vector<8xf32> to vector<8x1xf32>
    %115 = vector.broadcast %114 : vector<8x1xf32> to vector<8x20xf32>
    %116 = arith.subf %112, %115 : vector<8x20xf32>
    %117 = math.exp %116 : vector<8x20xf32>
    %cst_54 = arith.constant dense<0.000000e+00> : vector<8xf32>
    %118 = vector.multi_reduction <add>, %117, %cst_54 [1] : vector<8x20xf32> to vector<8xf32>
    %119 = vector.shape_cast %118 : vector<8xf32> to vector<8x1xf32>
    %120 = tpu.reciprocal %119 {approx = true} : vector<8x1xf32> -> vector<8x1xf32>
    %121 = vector.broadcast %120 : vector<8x1xf32> to vector<8x20xf32>
    %122 = arith.mulf %117, %121 : vector<8x20xf32>
    %cst_55 = arith.constant dense<0.000000e+00> : vector<8x4xf32>
    %123 = tpu.matmul %122, %109, %cst_55 {dimension_numbers = #tpu.dot_dimension_numbers<[1], [0], [0], [1], [0, 0, 1, 1], [], []>} : vector<8x20xf32>, vector<20x4xf32>, vector<8x4xf32> -> vector<8x4xf32>
    %124 = vector.extract_strided_slice %87 {offsets = [0, 8], sizes = [8, 4], strides = [1, 1]} : vector<8x32xf32> to vector<8x4xf32>
    %125 = vector.extract_strided_slice %88 {offsets = [0, 8], sizes = [20, 4], strides = [1, 1]} : vector<20x32xf32> to vector<20x4xf32>
    %126 = vector.extract_strided_slice %89 {offsets = [0, 8], sizes = [20, 4], strides = [1, 1]} : vector<20x32xf32> to vector<20x4xf32>
    %cst_56 = arith.constant dense<0.000000e+00> : vector<8x20xf32>
    %127 = tpu.matmul %124, %125, %cst_56 {dimension_numbers = #tpu.dot_dimension_numbers<[1], [1], [0], [0], [0, 0, 1, 0], [], []>} : vector<8x4xf32>, vector<20x4xf32>, vector<8x20xf32> -> vector<8x20xf32>
    %cst_57 = arith.constant 5.000000e-01 : f32
    %128 = vector.broadcast %cst_57 : f32 to vector<8x20xf32>
    %129 = arith.mulf %127, %128 : vector<8x20xf32>
    %cst_58 = arith.constant dense<0xFF800000> : vector<8xf32>
    %130 = vector.multi_reduction <maximumf>, %129, %cst_58 [1] : vector<8x20xf32> to vector<8xf32>
    %131 = vector.shape_cast %130 : vector<8xf32> to vector<8x1xf32>
    %132 = vector.broadcast %131 : vector<8x1xf32> to vector<8x20xf32>
    %133 = arith.subf %129, %132 : vector<8x20xf32>
    %134 = math.exp %133 : vector<8x20xf32>
    %cst_59 = arith.constant dense<0.000000e+00> : vector<8xf32>
    %135 = vector.multi_reduction <add>, %134, %cst_59 [1] : vector<8x20xf32> to vector<8xf32>
    %136 = vector.shape_cast %135 : vector<8xf32> to vector<8x1xf32>
    %137 = tpu.reciprocal %136 {approx = true} : vector<8x1xf32> -> vector<8x1xf32>
    %138 = vector.broadcast %137 : vector<8x1xf32> to vector<8x20xf32>
    %139 = arith.mulf %134, %138 : vector<8x20xf32>
    %cst_60 = arith.constant dense<0.000000e+00> : vector<8x4xf32>
    %140 = tpu.matmul %139, %126, %cst_60 {dimension_numbers = #tpu.dot_dimension_numbers<[1], [0], [0], [1], [0, 0, 1, 1], [], []>} : vector<8x20xf32>, vector<20x4xf32>, vector<8x4xf32> -> vector<8x4xf32>
    %141 = vector.extract_strided_slice %87 {offsets = [0, 12], sizes = [8, 4], strides = [1, 1]} : vector<8x32xf32> to vector<8x4xf32>
    %142 = vector.extract_strided_slice %88 {offsets = [0, 12], sizes = [20, 4], strides = [1, 1]} : vector<20x32xf32> to vector<20x4xf32>
    %143 = vector.extract_strided_slice %89 {offsets = [0, 12], sizes = [20, 4], strides = [1, 1]} : vector<20x32xf32> to vector<20x4xf32>
    %cst_61 = arith.constant dense<0.000000e+00> : vector<8x20xf32>
    %144 = tpu.matmul %141, %142, %cst_61 {dimension_numbers = #tpu.dot_dimension_numbers<[1], [1], [0], [0], [0, 0, 1, 0], [], []>} : vector<8x4xf32>, vector<20x4xf32>, vector<8x20xf32> -> vector<8x20xf32>
    %cst_62 = arith.constant 5.000000e-01 : f32
    %145 = vector.broadcast %cst_62 : f32 to vector<8x20xf32>
    %146 = arith.mulf %144, %145 : vector<8x20xf32>
    %cst_63 = arith.constant dense<0xFF800000> : vector<8xf32>
    %147 = vector.multi_reduction <maximumf>, %146, %cst_63 [1] : vector<8x20xf32> to vector<8xf32>
    %148 = vector.shape_cast %147 : vector<8xf32> to vector<8x1xf32>
    %149 = vector.broadcast %148 : vector<8x1xf32> to vector<8x20xf32>
    %150 = arith.subf %146, %149 : vector<8x20xf32>
    %151 = math.exp %150 : vector<8x20xf32>
    %cst_64 = arith.constant dense<0.000000e+00> : vector<8xf32>
    %152 = vector.multi_reduction <add>, %151, %cst_64 [1] : vector<8x20xf32> to vector<8xf32>
    %153 = vector.shape_cast %152 : vector<8xf32> to vector<8x1xf32>
    %154 = tpu.reciprocal %153 {approx = true} : vector<8x1xf32> -> vector<8x1xf32>
    %155 = vector.broadcast %154 : vector<8x1xf32> to vector<8x20xf32>
    %156 = arith.mulf %151, %155 : vector<8x20xf32>
    %cst_65 = arith.constant dense<0.000000e+00> : vector<8x4xf32>
    %157 = tpu.matmul %156, %143, %cst_65 {dimension_numbers = #tpu.dot_dimension_numbers<[1], [0], [0], [1], [0, 0, 1, 1], [], []>} : vector<8x20xf32>, vector<20x4xf32>, vector<8x4xf32> -> vector<8x4xf32>
    %158 = vector.extract_strided_slice %87 {offsets = [0, 16], sizes = [8, 4], strides = [1, 1]} : vector<8x32xf32> to vector<8x4xf32>
    %159 = vector.extract_strided_slice %88 {offsets = [0, 16], sizes = [20, 4], strides = [1, 1]} : vector<20x32xf32> to vector<20x4xf32>
    %160 = vector.extract_strided_slice %89 {offsets = [0, 16], sizes = [20, 4], strides = [1, 1]} : vector<20x32xf32> to vector<20x4xf32>
    %cst_66 = arith.constant dense<0.000000e+00> : vector<8x20xf32>
    %161 = tpu.matmul %158, %159, %cst_66 {dimension_numbers = #tpu.dot_dimension_numbers<[1], [1], [0], [0], [0, 0, 1, 0], [], []>} : vector<8x4xf32>, vector<20x4xf32>, vector<8x20xf32> -> vector<8x20xf32>
    %cst_67 = arith.constant 5.000000e-01 : f32
    %162 = vector.broadcast %cst_67 : f32 to vector<8x20xf32>
    %163 = arith.mulf %161, %162 : vector<8x20xf32>
    %cst_68 = arith.constant dense<0xFF800000> : vector<8xf32>
    %164 = vector.multi_reduction <maximumf>, %163, %cst_68 [1] : vector<8x20xf32> to vector<8xf32>
    %165 = vector.shape_cast %164 : vector<8xf32> to vector<8x1xf32>
    %166 = vector.broadcast %165 : vector<8x1xf32> to vector<8x20xf32>
    %167 = arith.subf %163, %166 : vector<8x20xf32>
    %168 = math.exp %167 : vector<8x20xf32>
    %cst_69 = arith.constant dense<0.000000e+00> : vector<8xf32>
    %169 = vector.multi_reduction <add>, %168, %cst_69 [1] : vector<8x20xf32> to vector<8xf32>
    %170 = vector.shape_cast %169 : vector<8xf32> to vector<8x1xf32>
    %171 = tpu.reciprocal %170 {approx = true} : vector<8x1xf32> -> vector<8x1xf32>
    %172 = vector.broadcast %171 : vector<8x1xf32> to vector<8x20xf32>
    %173 = arith.mulf %168, %172 : vector<8x20xf32>
    %cst_70 = arith.constant dense<0.000000e+00> : vector<8x4xf32>
    %174 = tpu.matmul %173, %160, %cst_70 {dimension_numbers = #tpu.dot_dimension_numbers<[1], [0], [0], [1], [0, 0, 1, 1], [], []>} : vector<8x20xf32>, vector<20x4xf32>, vector<8x4xf32> -> vector<8x4xf32>
    %175 = vector.extract_strided_slice %87 {offsets = [0, 20], sizes = [8, 4], strides = [1, 1]} : vector<8x32xf32> to vector<8x4xf32>
    %176 = vector.extract_strided_slice %88 {offsets = [0, 20], sizes = [20, 4], strides = [1, 1]} : vector<20x32xf32> to vector<20x4xf32>
    %177 = vector.extract_strided_slice %89 {offsets = [0, 20], sizes = [20, 4], strides = [1, 1]} : vector<20x32xf32> to vector<20x4xf32>
    %cst_71 = arith.constant dense<0.000000e+00> : vector<8x20xf32>
    %178 = tpu.matmul %175, %176, %cst_71 {dimension_numbers = #tpu.dot_dimension_numbers<[1], [1], [0], [0], [0, 0, 1, 0], [], []>} : vector<8x4xf32>, vector<20x4xf32>, vector<8x20xf32> -> vector<8x20xf32>
    %cst_72 = arith.constant 5.000000e-01 : f32
    %179 = vector.broadcast %cst_72 : f32 to vector<8x20xf32>
    %180 = arith.mulf %178, %179 : vector<8x20xf32>
    %cst_73 = arith.constant dense<0xFF800000> : vector<8xf32>
    %181 = vector.multi_reduction <maximumf>, %180, %cst_73 [1] : vector<8x20xf32> to vector<8xf32>
    %182 = vector.shape_cast %181 : vector<8xf32> to vector<8x1xf32>
    %183 = vector.broadcast %182 : vector<8x1xf32> to vector<8x20xf32>
    %184 = arith.subf %180, %183 : vector<8x20xf32>
    %185 = math.exp %184 : vector<8x20xf32>
    %cst_74 = arith.constant dense<0.000000e+00> : vector<8xf32>
    %186 = vector.multi_reduction <add>, %185, %cst_74 [1] : vector<8x20xf32> to vector<8xf32>
    %187 = vector.shape_cast %186 : vector<8xf32> to vector<8x1xf32>
    %188 = tpu.reciprocal %187 {approx = true} : vector<8x1xf32> -> vector<8x1xf32>
    %189 = vector.broadcast %188 : vector<8x1xf32> to vector<8x20xf32>
    %190 = arith.mulf %185, %189 : vector<8x20xf32>
    %cst_75 = arith.constant dense<0.000000e+00> : vector<8x4xf32>
    %191 = tpu.matmul %190, %177, %cst_75 {dimension_numbers = #tpu.dot_dimension_numbers<[1], [0], [0], [1], [0, 0, 1, 1], [], []>} : vector<8x20xf32>, vector<20x4xf32>, vector<8x4xf32> -> vector<8x4xf32>
    %192 = vector.extract_strided_slice %87 {offsets = [0, 24], sizes = [8, 4], strides = [1, 1]} : vector<8x32xf32> to vector<8x4xf32>
    %193 = vector.extract_strided_slice %88 {offsets = [0, 24], sizes = [20, 4], strides = [1, 1]} : vector<20x32xf32> to vector<20x4xf32>
    %194 = vector.extract_strided_slice %89 {offsets = [0, 24], sizes = [20, 4], strides = [1, 1]} : vector<20x32xf32> to vector<20x4xf32>
    %cst_76 = arith.constant dense<0.000000e+00> : vector<8x20xf32>
    %195 = tpu.matmul %192, %193, %cst_76 {dimension_numbers = #tpu.dot_dimension_numbers<[1], [1], [0], [0], [0, 0, 1, 0], [], []>} : vector<8x4xf32>, vector<20x4xf32>, vector<8x20xf32> -> vector<8x20xf32>
    %cst_77 = arith.constant 5.000000e-01 : f32
    %196 = vector.broadcast %cst_77 : f32 to vector<8x20xf32>
    %197 = arith.mulf %195, %196 : vector<8x20xf32>
    %cst_78 = arith.constant dense<0xFF800000> : vector<8xf32>
    %198 = vector.multi_reduction <maximumf>, %197, %cst_78 [1] : vector<8x20xf32> to vector<8xf32>
    %199 = vector.shape_cast %198 : vector<8xf32> to vector<8x1xf32>
    %200 = vector.broadcast %199 : vector<8x1xf32> to vector<8x20xf32>
    %201 = arith.subf %197, %200 : vector<8x20xf32>
    %202 = math.exp %201 : vector<8x20xf32>
    %cst_79 = arith.constant dense<0.000000e+00> : vector<8xf32>
    %203 = vector.multi_reduction <add>, %202, %cst_79 [1] : vector<8x20xf32> to vector<8xf32>
    %204 = vector.shape_cast %203 : vector<8xf32> to vector<8x1xf32>
    %205 = tpu.reciprocal %204 {approx = true} : vector<8x1xf32> -> vector<8x1xf32>
    %206 = vector.broadcast %205 : vector<8x1xf32> to vector<8x20xf32>
    %207 = arith.mulf %202, %206 : vector<8x20xf32>
    %cst_80 = arith.constant dense<0.000000e+00> : vector<8x4xf32>
    %208 = tpu.matmul %207, %194, %cst_80 {dimension_numbers = #tpu.dot_dimension_numbers<[1], [0], [0], [1], [0, 0, 1, 1], [], []>} : vector<8x20xf32>, vector<20x4xf32>, vector<8x4xf32> -> vector<8x4xf32>
    %209 = vector.extract_strided_slice %87 {offsets = [0, 28], sizes = [8, 4], strides = [1, 1]} : vector<8x32xf32> to vector<8x4xf32>
    %210 = vector.extract_strided_slice %88 {offsets = [0, 28], sizes = [20, 4], strides = [1, 1]} : vector<20x32xf32> to vector<20x4xf32>
    %211 = vector.extract_strided_slice %89 {offsets = [0, 28], sizes = [20, 4], strides = [1, 1]} : vector<20x32xf32> to vector<20x4xf32>
    %cst_81 = arith.constant dense<0.000000e+00> : vector<8x20xf32>
    %212 = tpu.matmul %209, %210, %cst_81 {dimension_numbers = #tpu.dot_dimension_numbers<[1], [1], [0], [0], [0, 0, 1, 0], [], []>} : vector<8x4xf32>, vector<20x4xf32>, vector<8x20xf32> -> vector<8x20xf32>
    %cst_82 = arith.constant 5.000000e-01 : f32
    %213 = vector.broadcast %cst_82 : f32 to vector<8x20xf32>
    %214 = arith.mulf %212, %213 : vector<8x20xf32>
    %cst_83 = arith.constant dense<0xFF800000> : vector<8xf32>
    %215 = vector.multi_reduction <maximumf>, %214, %cst_83 [1] : vector<8x20xf32> to vector<8xf32>
    %216 = vector.shape_cast %215 : vector<8xf32> to vector<8x1xf32>
    %217 = vector.broadcast %216 : vector<8x1xf32> to vector<8x20xf32>
    %218 = arith.subf %214, %217 : vector<8x20xf32>
    %219 = math.exp %218 : vector<8x20xf32>
    %cst_84 = arith.constant dense<0.000000e+00> : vector<8xf32>
    %220 = vector.multi_reduction <add>, %219, %cst_84 [1] : vector<8x20xf32> to vector<8xf32>
    %221 = vector.shape_cast %220 : vector<8xf32> to vector<8x1xf32>
    %222 = tpu.reciprocal %221 {approx = true} : vector<8x1xf32> -> vector<8x1xf32>
    %223 = vector.broadcast %222 : vector<8x1xf32> to vector<8x20xf32>
    %224 = arith.mulf %219, %223 : vector<8x20xf32>
    %cst_85 = arith.constant dense<0.000000e+00> : vector<8x4xf32>
    %225 = tpu.matmul %224, %211, %cst_85 {dimension_numbers = #tpu.dot_dimension_numbers<[1], [0], [0], [1], [0, 0, 1, 1], [], []>} : vector<8x20xf32>, vector<20x4xf32>, vector<8x4xf32> -> vector<8x4xf32>
    %226 = tpu.concatenate %106, %123, %140, %157, %174, %191, %208, %225 in 1 : vector<8x4xf32>, vector<8x4xf32>, vector<8x4xf32>, vector<8x4xf32>, vector<8x4xf32>, vector<8x4xf32>, vector<8x4xf32>, vector<8x4xf32> -> vector<8x32xf32>
    %c0_86 = arith.constant 0 : index
    %c0_87 = arith.constant 0 : index
    %227 = vector.load %arg13[%c0_86, %c0_87] : memref<32x32xf32, #tpu.memory_space<vmem>>, vector<32x32xf32>
    %cst_88 = arith.constant dense<0.000000e+00> : vector<8x32xf32>
    %228 = tpu.matmul %226, %227, %cst_88 {dimension_numbers = #tpu.dot_dimension_numbers<[1], [0], [0], [1], [0, 0, 1, 1], [], []>} : vector<8x32xf32>, vector<32x32xf32>, vector<8x32xf32> -> vector<8x32xf32>
    %c0_89 = arith.constant 0 : index
    %c0_90 = arith.constant 0 : index
    %229 = vector.load %arg14[%c0_89, %c0_90] : memref<1x32xf32, #tpu.memory_space<vmem>>, vector<1x32xf32>
    %230 = vector.broadcast %229 : vector<1x32xf32> to vector<8x32xf32>
    %231 = arith.addf %228, %230 : vector<8x32xf32>
    %232 = arith.addf %76, %231 : vector<8x32xf32>
    %cst_91 = arith.constant dense<0.000000e+00> : vector<8xf32>
    %233 = vector.multi_reduction <add>, %232, %cst_91 [1] : vector<8x32xf32> to vector<8xf32>
    %234 = vector.shape_cast %233 : vector<8xf32> to vector<8x1xf32>
    %cst_92 = arith.constant 3.200000e+01 : f32
    %235 = vector.broadcast %cst_92 : f32 to vector<8x1xf32>
    %236 = arith.divf %234, %235 : vector<8x1xf32>
    %237 = vector.broadcast %236 : vector<8x1xf32> to vector<8x32xf32>
    %238 = arith.subf %232, %237 : vector<8x32xf32>
    %239 = arith.mulf %238, %238 : vector<8x32xf32>
    %cst_93 = arith.constant dense<0.000000e+00> : vector<8xf32>
    %240 = vector.multi_reduction <add>, %239, %cst_93 [1] : vector<8x32xf32> to vector<8xf32>
    %241 = vector.shape_cast %240 : vector<8xf32> to vector<8x1xf32>
    %cst_94 = arith.constant 3.200000e+01 : f32
    %242 = vector.broadcast %cst_94 : f32 to vector<8x1xf32>
    %243 = arith.divf %241, %242 : vector<8x1xf32>
    %cst_95 = arith.constant 9.99999997E-7 : f32
    %244 = vector.broadcast %cst_95 : f32 to vector<8x1xf32>
    %245 = arith.addf %243, %244 : vector<8x1xf32>
    %246 = math.rsqrt %245 : vector<8x1xf32>
    %247 = vector.broadcast %246 : vector<8x1xf32> to vector<8x32xf32>
    %248 = arith.mulf %238, %247 : vector<8x32xf32>
    %249 = vector.extract_strided_slice %5 {offsets = [0, 128], sizes = [1, 32], strides = [1, 1]} : vector<1x256xf32> to vector<1x32xf32>
    %250 = vector.extract_strided_slice %5 {offsets = [0, 160], sizes = [1, 32], strides = [1, 1]} : vector<1x256xf32> to vector<1x32xf32>
    %251 = vector.broadcast %249 : vector<1x32xf32> to vector<8x32xf32>
    %252 = arith.mulf %248, %251 : vector<8x32xf32>
    %253 = vector.broadcast %250 : vector<1x32xf32> to vector<8x32xf32>
    %254 = arith.addf %252, %253 : vector<8x32xf32>
    %c0_96 = arith.constant 0 : index
    %c0_97 = arith.constant 0 : index
    %255 = vector.load %arg15[%c0_96, %c0_97] : memref<32x64xf32, #tpu.memory_space<vmem>>, vector<32x64xf32>
    %cst_98 = arith.constant dense<0.000000e+00> : vector<8x64xf32>
    %256 = tpu.matmul %254, %255, %cst_98 {dimension_numbers = #tpu.dot_dimension_numbers<[1], [0], [0], [1], [0, 0, 1, 1], [], []>} : vector<8x32xf32>, vector<32x64xf32>, vector<8x64xf32> -> vector<8x64xf32>
    %c0_99 = arith.constant 0 : index
    %c0_100 = arith.constant 0 : index
    %257 = vector.load %arg16[%c0_99, %c0_100] : memref<1x64xf32, #tpu.memory_space<vmem>>, vector<1x64xf32>
    %258 = vector.broadcast %257 : vector<1x64xf32> to vector<8x64xf32>
    %259 = arith.addf %256, %258 : vector<8x64xf32>
    %260 = arith.negf %259 : vector<8x64xf32>
    %261 = math.exp %260 : vector<8x64xf32>
    %cst_101 = arith.constant 1.000000e+00 : f32
    %262 = vector.broadcast %cst_101 : f32 to vector<8x64xf32>
    %263 = arith.addf %262, %261 : vector<8x64xf32>
    %264 = arith.divf %262, %263 : vector<8x64xf32>
    %265 = arith.mulf %259, %264 : vector<8x64xf32>
    %c0_102 = arith.constant 0 : index
    %c0_103 = arith.constant 0 : index
    %266 = vector.load %arg17[%c0_102, %c0_103] : memref<64x32xf32, #tpu.memory_space<vmem>>, vector<64x32xf32>
    %cst_104 = arith.constant dense<0.000000e+00> : vector<8x32xf32>
    %267 = tpu.matmul %265, %266, %cst_104 {dimension_numbers = #tpu.dot_dimension_numbers<[1], [0], [0], [1], [0, 0, 1, 1], [], []>} : vector<8x64xf32>, vector<64x32xf32>, vector<8x32xf32> -> vector<8x32xf32>
    %c0_105 = arith.constant 0 : index
    %c0_106 = arith.constant 0 : index
    %268 = vector.load %arg18[%c0_105, %c0_106] : memref<1x32xf32, #tpu.memory_space<vmem>>, vector<1x32xf32>
    %269 = vector.broadcast %268 : vector<1x32xf32> to vector<8x32xf32>
    %270 = arith.addf %267, %269 : vector<8x32xf32>
    %cst_107 = arith.constant dense<0.000000e+00> : vector<8xf32>
    %271 = vector.multi_reduction <add>, %270, %cst_107 [1] : vector<8x32xf32> to vector<8xf32>
    %272 = vector.shape_cast %271 : vector<8xf32> to vector<8x1xf32>
    %cst_108 = arith.constant 3.200000e+01 : f32
    %273 = vector.broadcast %cst_108 : f32 to vector<8x1xf32>
    %274 = arith.divf %272, %273 : vector<8x1xf32>
    %275 = vector.broadcast %274 : vector<8x1xf32> to vector<8x32xf32>
    %276 = arith.subf %270, %275 : vector<8x32xf32>
    %277 = arith.mulf %276, %276 : vector<8x32xf32>
    %cst_109 = arith.constant dense<0.000000e+00> : vector<8xf32>
    %278 = vector.multi_reduction <add>, %277, %cst_109 [1] : vector<8x32xf32> to vector<8xf32>
    %279 = vector.shape_cast %278 : vector<8xf32> to vector<8x1xf32>
    %cst_110 = arith.constant 3.200000e+01 : f32
    %280 = vector.broadcast %cst_110 : f32 to vector<8x1xf32>
    %281 = arith.divf %279, %280 : vector<8x1xf32>
    %cst_111 = arith.constant 9.99999997E-7 : f32
    %282 = vector.broadcast %cst_111 : f32 to vector<8x1xf32>
    %283 = arith.addf %281, %282 : vector<8x1xf32>
    %284 = math.rsqrt %283 : vector<8x1xf32>
    %285 = vector.broadcast %284 : vector<8x1xf32> to vector<8x32xf32>
    %286 = arith.mulf %276, %285 : vector<8x32xf32>
    %287 = vector.extract_strided_slice %5 {offsets = [0, 192], sizes = [1, 32], strides = [1, 1]} : vector<1x256xf32> to vector<1x32xf32>
    %288 = vector.extract_strided_slice %5 {offsets = [0, 224], sizes = [1, 32], strides = [1, 1]} : vector<1x256xf32> to vector<1x32xf32>
    %289 = vector.broadcast %287 : vector<1x32xf32> to vector<8x32xf32>
    %290 = arith.mulf %286, %289 : vector<8x32xf32>
    %291 = vector.broadcast %288 : vector<1x32xf32> to vector<8x32xf32>
    %292 = arith.addf %290, %291 : vector<8x32xf32>
    %c0_112 = arith.constant 0 : index
    %c0_113 = arith.constant 0 : index
    %c0_114 = arith.constant 0 : index
    %293 = vector.load %arg19[%c0_112, %c0_113, %c0_114] : memref<1x8x32xf32, #tpu.memory_space<vmem>>, vector<1x8x32xf32>
    %294 = vector.shape_cast %293 : vector<1x8x32xf32> to vector<8x32xf32>
    %295 = vector.shape_cast %292 : vector<8x32xf32> to vector<1x8x32xf32>
    tpu.vector_store %arg19[%c0_112, %c0_113, %c0_114], %295 {strides = array<i32>} : memref<1x8x32xf32, #tpu.memory_space<vmem>>, vector<1x8x32xf32>,
    return
  }
  func.func @transform_0(%arg0: i32) -> (i32, i32, i32) {
    %c0_i32 = arith.constant 0 : i32
    %c0_i32_0 = arith.constant 0 : i32
    %c0_i32_1 = arith.constant 0 : i32
    return %arg0, %c0_i32, %c0_i32_0 : i32, i32, i32
  }
  func.func @transform_1(%arg0: i32) -> (i32, i32, i32) {
    %c0_i32 = arith.constant 0 : i32
    %c0_i32_0 = arith.constant 0 : i32
    %c0_i32_1 = arith.constant 0 : i32
    return %arg0, %c0_i32, %c0_i32_0 : i32, i32, i32
  }
  func.func @transform_2(%arg0: i32) -> (i32, i32, i32) {
    %c0_i32 = arith.constant 0 : i32
    %c0_i32_0 = arith.constant 0 : i32
    %c0_i32_1 = arith.constant 0 : i32
    return %arg0, %c0_i32, %c0_i32_0 : i32, i32, i32
  }
  func.func @transform_3(%arg0: i32) -> (i32, i32) {
    %c0_i32 = arith.constant 0 : i32
    %c0_i32_0 = arith.constant 0 : i32
    %c0_i32_1 = arith.constant 0 : i32
    return %c0_i32, %c0_i32_0 : i32, i32
  }
  func.func @transform_4(%arg0: i32) -> (i32, i32) {
    %c0_i32 = arith.constant 0 : i32
    %c0_i32_0 = arith.constant 0 : i32
    %c0_i32_1 = arith.constant 0 : i32
    return %c0_i32, %c0_i32_0 : i32, i32
  }
  func.func @transform_5(%arg0: i32) -> (i32, i32) {
    %c0_i32 = arith.constant 0 : i32
    %c0_i32_0 = arith.constant 0 : i32
    %c0_i32_1 = arith.constant 0 : i32
    return %c0_i32, %c0_i32_0 : i32, i32
  }
  func.func @transform_6(%arg0: i32) -> (i32, i32) {
    %c0_i32 = arith.constant 0 : i32
    %c0_i32_0 = arith.constant 0 : i32
    %c0_i32_1 = arith.constant 0 : i32
    return %c0_i32, %c0_i32_0 : i32, i32
  }
  func.func @transform_7(%arg0: i32) -> (i32, i32) {
    %c0_i32 = arith.constant 0 : i32
    %c0_i32_0 = arith.constant 0 : i32
    %c0_i32_1 = arith.constant 0 : i32
    return %c0_i32, %c0_i32_0 : i32, i32
  }
  func.func @transform_8(%arg0: i32) -> (i32, i32) {
    %c0_i32 = arith.constant 0 : i32
    %c0_i32_0 = arith.constant 0 : i32
    %c0_i32_1 = arith.constant 0 : i32
    return %c0_i32, %c0_i32_0 : i32, i32
  }
  func.func @transform_9(%arg0: i32) -> (i32, i32) {
    %c0_i32 = arith.constant 0 : i32
    %c0_i32_0 = arith.constant 0 : i32
    %c0_i32_1 = arith.constant 0 : i32
    return %c0_i32, %c0_i32_0 : i32, i32
  }
  func.func @transform_10(%arg0: i32) -> (i32, i32) {
    %c0_i32 = arith.constant 0 : i32
    %c0_i32_0 = arith.constant 0 : i32
    %c0_i32_1 = arith.constant 0 : i32
    return %c0_i32, %c0_i32_0 : i32, i32
  }
  func.func @transform_11(%arg0: i32) -> (i32, i32) {
    %c0_i32 = arith.constant 0 : i32
    %c0_i32_0 = arith.constant 0 : i32
    %c0_i32_1 = arith.constant 0 : i32
    return %c0_i32, %c0_i32_0 : i32, i32
  }
  func.func @transform_12(%arg0: i32) -> (i32, i32) {
    %c0_i32 = arith.constant 0 : i32
    %c0_i32_0 = arith.constant 0 : i32
    %c0_i32_1 = arith.constant 0 : i32
    return %c0_i32, %c0_i32_0 : i32, i32
  }
  func.func @transform_13(%arg0: i32) -> (i32, i32) {
    %c0_i32 = arith.constant 0 : i32
    %c0_i32_0 = arith.constant 0 : i32
    %c0_i32_1 = arith.constant 0 : i32
    return %c0_i32, %c0_i32_0 : i32, i32
  }
  func.func @transform_14(%arg0: i32) -> (i32, i32) {
    %c0_i32 = arith.constant 0 : i32
    %c0_i32_0 = arith.constant 0 : i32
    %c0_i32_1 = arith.constant 0 : i32
    return %c0_i32, %c0_i32_0 : i32, i32
  }
  func.func @transform_15(%arg0: i32) -> (i32, i32) {
    %c0_i32 = arith.constant 0 : i32
    %c0_i32_0 = arith.constant 0 : i32
    %c0_i32_1 = arith.constant 0 : i32
    return %c0_i32, %c0_i32_0 : i32, i32
  }
  func.func @transform_16(%arg0: i32) -> (i32, i32) {
    %c0_i32 = arith.constant 0 : i32
    %c0_i32_0 = arith.constant 0 : i32
    %c0_i32_1 = arith.constant 0 : i32
    return %c0_i32, %c0_i32_0 : i32, i32
  }
  func.func @transform_17(%arg0: i32) -> (i32, i32) {
    %c0_i32 = arith.constant 0 : i32
    %c0_i32_0 = arith.constant 0 : i32
    %c0_i32_1 = arith.constant 0 : i32
    return %c0_i32, %c0_i32_0 : i32, i32
  }
  func.func @transform_18(%arg0: i32) -> (i32, i32, i32) {
    %c0_i32 = arith.constant 0 : i32
    %c0_i32_0 = arith.constant 0 : i32
    %c0_i32_1 = arith.constant 0 : i32
    return %arg0, %c0_i32, %c0_i32_0 : i32, i32, i32
  }
}

</mosaic_0001>

<bundles_post_ra>
// kernel: tpu_custom_call.1
= control target key start
LH: loop header
LB: loop body
LE: loop exit
PB: predicated region body
PF: predicated region fallthrough
CT: control target
= control target key end

     0   :  { %s4642_s0 = inlined_call_operand.vmem [shape: s32[2,8,1], index: 0, kind: input, shape index: {}]   ;;  %s4643_s1 = inlined_call_operand.vmem [shape: f32[2,20,32], index: 1, kind: input, shape index: {}]   ;;  %s4644_s2 = inlined_call_operand.vmem [shape: f32[2,1,4], index: 2, kind: input, shape index: {}]   ;;  %s4645_s3 = inlined_call_operand.vmem [shape: f32[73,32], index: 3, kind: input, shape index: {}]   ;;  %s4646_s4 = inlined_call_operand.vmem [shape: f32[32,64], index: 4, kind: input, shape index: {}]   ;;  %s4647_s5 = inlined_call_operand.vmem [shape: f32[1,64], index: 5, kind: input, shape index: {}]   ;;  %s4648_s6 = inlined_call_operand.vmem [shape: f32[64,32], index: 6, kind: input, shape index: {}]   ;;  %s4649_s7 = inlined_call_operand.vmem [shape: f32[1,32], index: 7, kind: input, shape index: {}]   ;;  %s4650_s8 = inlined_call_operand.vmem [shape: f32[4,256], index: 8, kind: input, shape index: {}]   ;;  %s4651_s9 = inlined_call_operand.vmem [shape: f32[1,256], index: 9, kind: input, shape index: {}]   ;;  %s4652_s10 = inlined_call_operand.vmem [shape: f32[32,96], index: 10, kind: input, shape index: {}]   ;;  %s4653_s11 = inlined_call_operand.vmem [shape: f32[1,96], index: 11, kind: input, shape index: {}]   ;;  %s4654_s12 = inlined_call_operand.vmem [shape: f32[32,32], index: 12, kind: input, shape index: {}]   ;;  %s4655_s13 = inlined_call_operand.vmem [shape: f32[1,32], index: 13, kind: input, shape index: {}]   ;;  %s4656_s14 = inlined_call_operand.vmem [shape: f32[32,64], index: 14, kind: input, shape index: {}]   ;;  %s4657_s15 = inlined_call_operand.vmem [shape: f32[1,64], index: 15, kind: input, shape index: {}]   ;;  %s4658_s16 = inlined_call_operand.vmem [shape: f32[64,32], index: 16, kind: input, shape index: {}]   ;;  %s4659_s17 = inlined_call_operand.vmem [shape: f32[1,32], index: 17, kind: input, shape index: {}]   ;;  %s4660_s18 = inlined_call_operand.hbm [shape: f32[2,8,32], index: 18, kind: output, shape index: {}]  }
   0x1   :  { %4668 = sst [smem:[#allocation11_spill]] %s4642_s0 }
   0x2   :  { %4669 = sst [smem:[#allocation12_spill]] %s4643_s1 }
   0x3   :  { %4670 = sst [smem:[#allocation13_spill]] %s4644_s2 }
   0x4   :  { %4671 = sst [smem:[#allocation14_spill]] %s4660_s18 }
   0x5   :  { %23 = vsyncpa [#allocation3], 0 }
   0x6   :  { %25 = vsyncpa [#allocation3 + $0x1], 0  ;;  %s3989_s27 = smov 0   ;;  %s3991_s28 = smov 0  }
   0x7   :  { %s3993_s29 = smov 0   ;;  %s3995_s30 = smov 0  }
   0x8 LB: > { %4672 = sst [smem:[#allocation5_spill]] %s3845_s27  ;;  %s4010_s0 = sadd.s32 4294967295, %s3857_s30   ;;  %s3857_s30 = sphi %s3995_s30, %s4687_s30   ;;  %s3853_s29 = sphi %s3993_s29, %s4689_s29   ;;  %s3849_s28 = sphi %s3991_s28, %s4691_s28   ;;  %s3845_s27 = sphi %s3989_s27, %s4690_s27  }
   0x9   : > { %4673 = sst [smem:[#allocation6_spill]] %s3853_s29  ;;  %s3171_s19 = sadd.s32 4294967294, %s3857_s30  }
   0xa   : > { %4674 = sst [smem:[#allocation7_spill]] %s3857_s30  ;;  %s4014_s1 = sadd.s32 1, %s3857_s30  }
   0xb   : > { %4675 = sst [smem:[#allocation8_spill]] %s4014_s1  ;;  %s431_s20 = sadd.s32 1, %s3853_s29 }
   0xc   : > { %s428_s21 = ssub.s32 %s3857_s30, %s4014_s1  ;;  %p441_p0 = scmp.ne.s32.totalorder %s3853_s29, %s3849_s28 }
   0xd   : > { %p429_p1 = scmp.eq.s32.totalorder %s428_s21, 0  ;;  %p442_p2 = scmp.eq.s32.totalorder %s4010_s0, 1 }
   0xe   : > { %p447_p3 = scmp.ne.s32.totalorder %s3849_s28, %s3845_s27  ;;  %p448_p4 = scmp.eq.s32.totalorder %s3171_s19, 1 }
   0xf   : > { %s4025_s22 = scalar_select %p429_p1, %s3853_s29, %s431_s20  }
  0x10   : > { %p4027_p5 = por %p442_p2, %p441_p0  ;;  %p4031_p6 = por %p448_p4, %p447_p3 }
  0x11   : > { %4676 = sst [smem:[#allocation9_spill]] %s4025_s22  ;;  %p3174_p7 = scmp.ge.s32.totalorder %s3857_s30, 1 }
  0x12   : > { %s4678_s23 = scalar_select %p4031_p6, 1, 0 }
  0x13   : > { %p532_p8 = scmp.lt.s32.totalorder %s3857_s30, 3 }
  0x14   : > { %4679 = sst [smem:[#allocation10_spill]] %s4678_s23 }
  0x15   : > { %p533_p9 = pnand %p3174_p7, %p532_p8 }
  0x16   : > { %p593_p10 = scmp.lt.s32.totalorder (!%p533_p9), %s4010_s0, 1  ;;  %s4680_s23 = sld [smem:[#allocation11_spill]] (!%p533_p9) }
  0x17   : > { %536 = sbr.rel (%p533_p9) target bundleno = 5356 (0x14ec), region = 92  ;;  %s4681_s21 = sld [smem:[#allocation12_spill]] (!%p533_p9) }
  0x18   : > { %s4682_s1 = sld [smem:[#allocation13_spill]] (!%p533_p9)  ;;  %s3865_s19 = smov (!%p533_p9), 92  }
  0x19   : > { %s3868_s18 = smov (!%p533_p9), 120   ;;  %s3869_s29 = smov (!%p533_p9), 60  }
  0x1a   : > { %s3870_s30 = smov (!%p533_p9), 56  }
  0x1c   : > { %v707_v0 = vld [vmem:[%s4646_s4 + $0x18] sm:$0xff]  ;;  %v3859_v1 = vmov 0.0   ;;  %v706_v2 = vld [vmem:[%s4646_s4 + $0x10] sm:$0xff]  ;;  %vm3860_vm0 = vmmov 0   ;;  %s4048_s20 = scalar_select %p593_p10, %s4010_s0, 1  ;;  %v3861_v3 = vmov 0   ;;  %v611_v31 = vlaneseq }
  0x1d   : > { %3383 = vmatprep.subr.mxu1 %v3859_v1  ;;  %3391 = vmatprep.mubr.msk.f32.mxu1 %vm3860_vm0, %v3859_v1  ;;  %v705_v4 = vld [vmem:[%s4646_s4 + $0x8] sm:$0xff]  ;;  %v704_v5 = vld [vmem:[%s4646_s4] sm:$0xff]  ;;  %vm715_vm1 = vcmask 261120   ;;  %vm625_vm2 = vcmask 1043456   ;;  %vm621_vm3 = vcmask 31744   ;;  %v833_v13 = vld [vmem:[%s4648_s6 + $0x38] sm:$0xff] }
  0x1e   : > { %3384 = vmatpush3.msra.mxu1 %v707_v0  ;;  %3735 = vset.pattern.permute.xlu0 %v3861_v3  ;;  %s3661_s25 = smul.u32 24, %s4048_s20  ;;  %s3176_s26 = sshll.u32 %s4048_s20, 3  ;;  %v606_v10 = vld [vmem:[%s4650_s8] sm:$0xff]  ;;  %v832_v14 = vld [vmem:[%s4648_s6 + $0x30] sm:$0xff]  ;;  %v831_v15 = vld [vmem:[%s4648_s6 + $0x28] sm:$0xff]  ;;  %vm1009_vm4 = vcmask 1040384  }
  0x1f   : > { %3385 = vmatprep.subr.mxu1 %v3859_v1  ;;  %694 = vmatprep.mubr.f32.mxu0 %v3859_v1  ;;  %s596_s27 = scalar_lea.vmem %s4680_s23, %s3176_s26  ;;  %v609_v11 = vcombine.high %v606_v10, %v606_v10  ;;  %s604_s22 = scalar_lea.vmem %s4682_s1, %s4048_s20  ;;  %v830_v16 = vld [vmem:[%s4648_s6 + $0x20] sm:$0xff]  ;;  %v829_v17 = vld [vmem:[%s4648_s6 + $0x18] sm:$0xff]  ;;  %v1004_v18 = vld [vmem:[%s4645_s3 + $0x48] sm:$0x1]  ;;  %v988_v32 = vand.u32 127, %v611_v31  ;;  %vm1005_vm5 = vcmask 596992  }
  0x20   : > { %3386 = vmatpush3.msra.mxu1 %v706_v2  ;;  %s601_s24 = scalar_lea.vmem %s4681_s21, %s3661_s25  ;;  %v986_v6 = vld [vmem:[%s596_s27] sm:$0xff]  ;;  %v828_v19 = vld [vmem:[%s4648_s6 + $0x10] sm:$0xff]  ;;  %v827_v21 = vld [vmem:[%s4648_s6 + $0x8] sm:$0xff]  ;;  %v612_v35 = vshrl.u32 %v611_v31, 7  ;;  %vm841_vm7 = vcmask 523264   ;;  %vm937_vm8 = vcmask 257024  }
  0x21   : > { %3387 = vmatprep.subr.mxu1 %v3859_v1  ;;  %v701_v7 = vld [vmem:[%s601_s24] sm:$0xff]  ;;  %990 = vperm.xlu0 %3735, %v986_v6   ;;  %v702_v8 = vld [vmem:[%s601_s24 + $0x8] sm:$0xff]  ;;  %v703_v9 = vld [vmem:[%s601_s24 + $0x10] sm:$0xf]  ;;  %s3862_s20 = smov 64   ;;  %s3863_s27 = smov 96  }
  0x22   : > { %3388 = vmatpush3.msra.mxu1 %v705_v4  ;;  %3178 = vmatprep.subr.msk.mxu0 %vm625_vm2, %v609_v11  ;;  %v605_v12 = vld [vmem:[%s604_s22] sm:$0x1]  ;;  %v1002_v22 = vld [vmem:[%s4645_s3 + $0x38] sm:$0xff]  ;;  %v1001_v24 = vld [vmem:[%s4645_s3 + $0x30] sm:$0xff]  ;;  %v617_v37 = vsub.s32 1, %v612_v35  ;;  %s3864_s23 = smov 32  }
  0x23   : > { %3389 = vmatprep.subr.mxu1 %v3859_v1  ;;  %3179 = vmatpush1.msk.msra.mxu0 %vm625_vm2, %v606_v10  ;;  %v1003_v20 = vld [vmem:[%s4645_s3 + $0x40] sm:$0xff]  ;;  %v1000_v25 = vld [vmem:[%s4645_s3 + $0x28] sm:$0xff]  ;;  %v998_v27 = vld [vmem:[%s4645_s3 + $0x18] sm:$0xff]  ;;  %s3866_s21 = smov 124   ;;  %s3867_s24 = smov 88   ;;  %vm1366_vm9 = vcmask 162816  }
  0x24   : > { %3390 = vmatpush3.msra.mxu1 %v704_v5  ;;  %3180 = vmatmul.mubr.msk.f32.vlgmr.msra.gmra.mxu0 %vm621_vm3, %v605_v12  ;;  %v826_v23 = vld [vmem:[%s4648_s6] sm:$0xff]  ;;  %v997_v28 = vld [vmem:[%s4645_s3 + $0x10] sm:$0xff]  ;;  %v996_v29 = vld [vmem:[%s4645_s3 + $0x8] sm:$0xff]  ;;  %s3871_s1 = smov 84   ;;  %s3872_s22 = smov 80   ;;  %vm2757_vm10 = vcmask 64512  }
  0x25   : > { %3392 = vmatmul.mubr.msk.f32.vlgmr.msra.gmra.mxu1 %vm715_vm1, %v701_v7  ;;  %3425 = vmatprep.subr.mxu1 %v3859_v1  ;;  %v999_v26 = vld [vmem:[%s4645_s3 + $0x20] sm:$0xff]  ;;  %s3873_s25 = smov 116   ;;  %s3874_s26 = smov 112   ;;  %vm2759_vm11 = vcmask 97280   ;;  %vm2761_vm12 = vcmask 130048   ;;  %vm2764_vm13 = vcmask 195584  }
  0x26   : > { %3394 = vmatprep.mubr.msk.f32.mxu1 %vm3860_vm0, %v3859_v1  ;;  %3400 = vmatprep.subr.mxu0 %v3859_v1  ;;  %v995_v30 = vld [vmem:[%s4645_s3] sm:$0xff]  ;;  %vm2766_vm14 = vcmask 228352  }
  0x27   : > { %3416 = vmatprep.mubr.msk.f32.mxu0 %vm3860_vm0, %v3859_v1  ;;  %3401 = vmatpush3.msra.mxu0 %v833_v13  ;;  %v4169_v36 = vld [vmem:[%s4651_s9] sm:$0x3] }
  0x28   : > { %3402 = vmatprep.subr.mxu0 %v3859_v1  ;;  %3426 = vmatpush3.msk.msra.mxu1 %vm1009_vm4, %v1004_v18  ;;  %v4172_v38 = vrot.slane %v4169_v36, %v617_v37  ;;  %v3181_v39 = vld [vmem:[%s4647_s5] ss:$0 sm:$0xff]  ;;  %v4194_v18 = vsub.s32 0, %v612_v35 }
  0x29   : > { %3395 = vmatmul.mubr.msk.f32.gmra.mxu1 %vm715_vm1, %v702_v8  ;;  %3403 = vmatpush3.msra.mxu0 %v832_v14  ;;  %v3188_v5 = vld [vmem:[%s4649_s7] ss:$0 sm:$0xff] }
  0x2a   : > { %3397 = vmatprep.mubr.msk.f32.mxu1 %vm3860_vm0, %v3859_v1  ;;  %3404 = vmatprep.subr.mxu0 %v3859_v1 }
  0x2b   : > { %3405 = vmatpush3.msra.mxu0 %v831_v15  ;;  %3427 = vmatprep.subr.mxu1 %v3859_v1 }
  0x2c   : > { %3406 = vmatprep.subr.mxu0 %v3859_v1  ;;  %3428 = vmatpush3.msra.mxu1 %v1003_v20  ;;  %v614_v20 = vrot.slane %v4169_v36, %v4194_v18 }
  0x2d   : > { %3398 = vmatmul.mubr.msk.f32.gmra.mxu1 %vm715_vm1, %v703_v9  ;;  %3407 = vmatpush3.msra.mxu0 %v830_v16 }
  0x2e   : > { %3445 = vmatprep.mubr.msk.f32.mxu1 %vm3860_vm0, %v3859_v1  ;;  %3408 = vmatprep.subr.mxu0 %v3859_v1 }
  0x2f   : > { %3409 = vmatpush3.msra.mxu0 %v829_v17  ;;  %3429 = vmatprep.subr.mxu1 %v3859_v1 }
  0x30   : > { %3410 = vmatprep.subr.mxu0 %v3859_v1  ;;  %3430 = vmatpush3.msra.mxu1 %v1002_v22 }
  0x31   : > { %3411 = vmatpush3.msra.mxu0 %v828_v19  ;;  %3431 = vmatprep.subr.mxu1 %v3859_v1 }
  0x32   : > { %3412 = vmatprep.subr.mxu0 %v3859_v1  ;;  %3432 = vmatpush3.msra.mxu1 %v1001_v24 }
  0x33   : > { %3413 = vmatpush3.msra.mxu0 %v827_v21  ;;  %3433 = vmatprep.subr.mxu1 %v3859_v1 }
  0x34   : > { %3414 = vmatprep.subr.mxu0 %v3859_v1  ;;  %3434 = vmatpush3.msra.mxu1 %v1000_v25 }
  0x35   : > { %3415 = vmatpush3.msra.mxu0 %v826_v23  ;;  %3435 = vmatprep.subr.mxu1 %v3859_v1 }
  0x36   : > { %3448 = vmatprep.subr.mxu0 %v3859_v1  ;;  %3436 = vmatpush3.msra.mxu1 %v999_v26 }
  0x37   : > { %3437 = vmatprep.subr.mxu1 %v3859_v1 }
  0x38   : > { %3438 = vmatpush3.msra.mxu1 %v998_v27 }
  0x39   : > { %3439 = vmatprep.subr.mxu1 %v3859_v1 }
  0x3a   : > { %3440 = vmatpush3.msra.mxu1 %v997_v28 }
  0x3b   : > { %3441 = vmatprep.subr.mxu1 %v3859_v1 }
  0x3c   : > { %3442 = vmatpush3.msra.mxu1 %v996_v29 }
  0x3d   : > { %3443 = vmatprep.subr.mxu1 %v3859_v1 }
  0x3e   : > { %3444 = vmatpush3.msra.mxu1 %v995_v30 }
  0x3f   : > { %3459 = vmatprep.subr.mxu1 %v3859_v1 }
  0x9c   : > { %v991_v33 = vpop.permute.xlu0 %990 }
  0x9d   : > { %vm992_vm6 = vcmp.eq.s32.totalorder %v991_v33, %v988_v32 }
  0x9e   : > { %v3192_v34 = vsel %vm992_vm6, 1.0, %v3859_v1 }
  0x9f   : > { %3446 = vmatmul.mubr.msk.f32.vlgmr.msra.gmra.mxu1 %vm1005_vm5, %v3192_v34 }
  0xa0   : > { %3467 = vmatprep.mubr.msk.f32.mxu1 %vm3860_vm0, %v3859_v1 }
  0xe4   : > { %v696_v3 = vpop.f32.mrf.mxu0 }
  0xe5   : > { %v791_v40 = vpop.f32.mrf.mxu1  ;;  %v697_v21 = vadd.f32 %v696_v3, %v614_v20 }
  0xe6   : > { %v792_v41 = vadd.f32 %v3181_v39, %v791_v40  ;;  %v4186_v4 = vpop.f32.mrf.mxu0 }
  0xe7   : > { %v3393_v42 = vpop.f32.mrf.mxu1  ;;  %v4200_v22 = vrot.slane %v697_v21, %v4194_v18 }
  0xe8   : > { %v3185_v43 = vmul.f32 -1.442695, %v792_v41 }
  0xe9   : > { %v796_v44 = vpop.f32.mrf.mxu1 }
  0xea   : > { %3737 = vpow2.f32 %v3185_v43  ;;  %v797_v45 = vadd.f32 %v3181_v39, %v796_v44  ;;  %v1107_v44 = vld [vmem:[%s4652_s10 + $0x18] sm:$0xff] }
  0xeb   : > { %v3396_v46 = vpop.f32.mrf.mxu1  ;;  %3460 = vmatpush3.msra.mxu1 %v1107_v44 }
  0xec   : > { %v3186_v47 = vmul.f32 -1.442695, %v797_v45  ;;  %3461 = vmatprep.subr.mxu1 %v3859_v1  ;;  %v1105_v46 = vld [vmem:[%s4652_s10 + $0x8] sm:$0xff] }
  0xed   : > { %v801_v48 = vpop.f32.mrf.mxu1 }
  0xee   : > { %3739 = vpow2.f32 %v3186_v47  ;;  %v802_v49 = vadd.f32 %v3181_v39, %v801_v48  ;;  %v1104_v47 = vld [vmem:[%s4652_s10] sm:$0xff] }
  0xef   : > { %v3399_v50 = vpop.f32.mrf.mxu1 }
  0xf0   : > { %v3187_v51 = vmul.f32 -1.442695, %v802_v49 }
  0xf2   : > { %3741 = vpow2.f32 %v3187_v51 }
  0xf7   : > { %v3738_v52 = vpop.eup %3737 }
  0xf8   : > { %v814_v53 = vadd.f32 1.0, %v3738_v52 }
  0xfa   : > { %3743 = vrcp.f32 %v814_v53 }
  0xfb   : > { %v3740_v54 = vpop.eup %3739 }
  0xfc   : > { %v815_v55 = vadd.f32 1.0, %v3740_v54 }
  0xfe   : > { %3745 = vrcp.f32 %v815_v55 }
  0xff   : > { %v3742_v56 = vpop.eup %3741 }
 0x100   : > { %v816_v57 = vadd.f32 1.0, %v3742_v56 }
 0x102   : > { %3747 = vrcp.f32 %v816_v57 }
 0x107   : > { %v3744_v58 = vpop.eup %3743 }
 0x108   : > { %v823_v59 = vmul.f32 %v3744_v58, %v792_v41 }
 0x10a   : > { %3417 = vmatmul.mubr.msk.f32.vlgmr.msra.gmra.mxu0 %vm841_vm7, %v823_v59 }
 0x10b   : > { %v3746_v60 = vpop.eup %3745  ;;  %3419 = vmatprep.mubr.msk.f32.mxu0 %vm3860_vm0, %v3859_v1  ;;  %3449 = vmatpush3.msra.mxu0 %v1107_v44 }
 0x10c   : > { %v824_v61 = vmul.f32 %v3746_v60, %v797_v45  ;;  %3450 = vmatprep.subr.mxu0 %v3859_v1  ;;  %v1106_v45 = vld [vmem:[%s4652_s10 + $0x10] sm:$0xff] }
 0x10d   : > { %3451 = vmatpush3.msra.mxu0 %v1106_v45  ;;  %3462 = vmatpush3.msra.mxu1 %v1106_v45 }
 0x10e   : > { %3420 = vmatmul.mubr.msk.f32.gmra.mxu0 %vm841_vm7, %v824_v61  ;;  %3452 = vmatprep.subr.mxu0 %v3859_v1 }
 0x10f   : > { %v3748_v62 = vpop.eup %3747  ;;  %3422 = vmatprep.mubr.msk.f32.mxu0 %vm3860_vm0, %v3859_v1  ;;  %3453 = vmatpush3.msra.mxu0 %v1105_v46 }
 0x110   : > { %v825_v63 = vmul.f32 %v3748_v62, %v802_v49  ;;  %3463 = vmatprep.subr.mxu1 %v3859_v1  ;;  %3454 = vmatprep.subr.mxu0 %v3859_v1 }
 0x111   : > { %3464 = vmatpush3.msra.mxu1 %v1105_v46  ;;  %3455 = vmatpush3.msra.mxu0 %v1104_v47 }
 0x112   : > { %3423 = vmatmul.mubr.msk.f32.gmra.mxu0 %vm841_vm7, %v825_v63  ;;  %3465 = vmatprep.subr.mxu1 %v3859_v1 }
 0x113   : > { %3456 = vmatprep.mubr.msk.f32.mxu0 %vm3860_vm0, %v3859_v1  ;;  %3476 = vmatprep.subr.mxu0 %v3859_v1 }
 0x114   : > { %3466 = vmatpush3.msra.mxu1 %v1104_v47 }
 0x115   : > { %3494 = vmatprep.subr.mxu1 %v3859_v1 }
 0x15f   : > { %v1079_v0 = vpop.f32.mrf.mxu1 }
 0x160   : > { %v1083_v19 = vsel %vm715_vm1, %v1079_v0, 0.0 }
 0x161   : > { %v3447_v2 = vpop.f32.mrf.mxu1 }
 0x1ca   : > { %v917_v6 = vpop.f32.mrf.mxu0 }
 0x1cb   : > { %v918_v7 = vadd.f32 %v3188_v5, %v917_v6 }
 0x1cc   : > { %v3418_v8 = vpop.f32.mrf.mxu0 }
 0x1cd   : > { %v931_v9 = vsel %vm715_vm1, %v918_v7, 0.0 }
 0x1ce   : > { %v922_v10 = vpop.f32.mrf.mxu0  ;;  %932 = vadd.xlane.f32.xlu0 %v931_v9 }
 0x1cf   : > { %v923_v11 = vadd.f32 %v3188_v5, %v922_v10 }
 0x1d0   : > { %v3421_v12 = vpop.f32.mrf.mxu0 }
 0x1d1   : > { %v934_v13 = vsel %vm715_vm1, %v923_v11, 0.0 }
 0x1d2   : > { %935 = vadd.xlane.f32.xlu1 %v934_v13  ;;  %v927_v14 = vpop.f32.mrf.mxu0 }
 0x1d3   : > { %v928_v15 = vadd.f32 %v3188_v5, %v927_v14 }
 0x1d4   : > { %v3424_v16 = vpop.f32.mrf.mxu0 }
 0x1d5   : > { %v938_v17 = vsel %vm937_vm8, %v928_v15, 0.0 }
 0x1d6   : > { %939 = vadd.xlane.f32.xlu1 %v938_v17 }
 0x1da   : > { %1084 = vadd.xlane.f32.xlu1 %v1083_v19 }
 0x1e4   : > { %1096 = vrot.lane.b32.xlu0 %v4200_v22, %s3862_s20 }
 0x257   : > { %v933_v24 = vpop.xlane.xlu0 %932 }
 0x258   : > { %v942_v26 = vmul.f32 0.03125, %v933_v24 }
 0x25a   : > { %v4204_v29 = vsub.f32 %v918_v7, %v942_v26 }
 0x25b   : > { %v936_v23 = vpop.xlane.xlu1 %935  ;;  %v1097_v63 = vpop.permute.xlu0 %1096 }
 0x25c   : > { %v943_v30 = vmul.f32 0.03125, %v936_v23  ;;  %v948_v36 = vmul.f32 %v4204_v29, %v4204_v29  ;;  %v3195_v23 = vld [vmem:[%s4653_s11] ss:$0 sm:$0xff] }
 0x25e   : > { %v4206_v33 = vsub.f32 %v923_v11, %v943_v30  ;;  %v951_v39 = vsel %vm715_vm1, %v948_v36, 0.0 }
 0x25f   : > { %v940_v25 = vpop.xlane.xlu1 %939 }
 0x260   : > { %v944_v34 = vmul.f32 0.03125, %v940_v25  ;;  %v949_v40 = vmul.f32 %v4206_v33, %v4206_v33 }
 0x262   : > { %v4211_v37 = vsub.f32 %v928_v15, %v944_v34  ;;  %v954_v41 = vsel %vm715_vm1, %v949_v40, 0.0 }
 0x263   : > { %v1085_v27 = vpop.xlane.xlu1 %1084 }
 0x264   : > { %v1086_v28 = vmul.f32 0.03125, %v1085_v27  ;;  %v950_v42 = vmul.f32 %v4211_v37, %v4211_v37 }
 0x266   : > { %v1087_v31 = vsub.f32 %v1079_v0, %v1086_v28  ;;  %v957_v43 = vsel %vm937_vm8, %v950_v42, 0.0 }
 0x268   : > { %v1088_v32 = vmul.f32 %v1087_v31, %v1087_v31 }
 0x26a   : > { %v1089_v35 = vsel %vm715_vm1, %v1088_v32, 0.0 }
 0x26b   : > { %1090 = vadd.xlane.f32.xlu1 %v1089_v35 }
 0x26f   : > { %952 = vadd.xlane.f32.xlu1 %v951_v39 }
 0x273   : > { %955 = vadd.xlane.f32.xlu1 %v954_v41 }
 0x277   : > { %958 = vadd.xlane.f32.xlu1 %v957_v43 }
 0x288   : > { %980 = vrot.lane.b32.xlu1 %v4200_v22, %s3863_s27 }
 0x28c   : > { %1100 = vrot.lane.b32.xlu1 %v4200_v22, %s3864_s23 }
 0x2f4   : > { %v1091_v48 = vpop.xlane.xlu1 %1090 }
 0x2f5   : > { %v1092_v49 = vmul.f32 0.03125, %v1091_v48 }
 0x2f7   : > { %v1093_v50 = vadd.f32 1e-06, %v1092_v49 }
 0x2f8   : > { %v953_v51 = vpop.xlane.xlu1 %952 }
 0x2f9   : > { %3749 = vrsqrt.f32 %v1093_v50  ;;  %v960_v52 = vmul.f32 0.03125, %v953_v51 }
 0x2fb   : > { %v963_v53 = vadd.f32 1e-06, %v960_v52 }
 0x2fc   : > { %v956_v54 = vpop.xlane.xlu1 %955 }
 0x2fd   : > { %3751 = vrsqrt.f32 %v963_v53  ;;  %v961_v55 = vmul.f32 0.03125, %v956_v54 }
 0x2ff   : > { %v964_v56 = vadd.f32 1e-06, %v961_v55 }
 0x300   : > { %v959_v57 = vpop.xlane.xlu1 %958 }
 0x301   : > { %3753 = vrsqrt.f32 %v964_v56  ;;  %v962_v58 = vmul.f32 0.03125, %v959_v57 }
 0x303   : > { %v965_v59 = vadd.f32 1e-06, %v962_v58 }
 0x304   : > { %v981_v60 = vpop.permute.xlu1 %980 }
 0x305   : > { %3755 = vrsqrt.f32 %v965_v59 }
 0x306   : > { %v3750_v61 = vpop.eup %3749 }
 0x307   : > { %v1095_v62 = vmul.f32 %v3750_v61, %v1087_v31 }
 0x308   : > { %v1101_v3 = vpop.permute.xlu1 %1100 }
 0x309   : > { %v1099_v0 = vmul.f32 %v1097_v63, %v1095_v62 }
 0x30a   : > { %v3752_v2 = vpop.eup %3751 }
 0x30b   : > { %v969_v5 = vmul.f32 %v3752_v2, %v4204_v29  ;;  %v4245_v6 = vadd.f32 %v1101_v3, %v1099_v0 }
 0x30d   : > { %v976_v7 = vmul.f32 %v4200_v22, %v969_v5  ;;  %3457 = vmatmul.mubr.msk.f32.vlgmr.msra.gmra.mxu0 %vm715_vm1, %v4245_v6 }
 0x30e   : > { %v3754_v8 = vpop.eup %3753  ;;  %3482 = vmatprep.mubr.msk.f32.mxu0 %vm3860_vm0, %v3859_v1 }
 0x30f   : > { %v970_v9 = vmul.f32 %v3754_v8, %v4206_v33  ;;  %v983_v10 = vadd.f32 %v981_v60, %v976_v7 }
 0x311   : > { %v977_v11 = vmul.f32 %v4200_v22, %v970_v9  ;;  %3468 = vmatmul.mubr.msk.f32.vlgmr.msra.gmra.mxu1 %vm715_vm1, %v983_v10 }
 0x312   : > { %v3756_v12 = vpop.eup %3755  ;;  %3470 = vmatprep.mubr.msk.f32.mxu1 %vm3860_vm0, %v3859_v1 }
 0x313   : > { %v971_v13 = vmul.f32 %v3756_v12, %v4211_v37  ;;  %v984_v14 = vadd.f32 %v981_v60, %v977_v11 }
 0x315   : > { %v978_v15 = vmul.f32 %v4200_v22, %v971_v13  ;;  %3471 = vmatmul.mubr.msk.f32.gmra.mxu1 %vm715_vm1, %v984_v14 }
 0x316   : > { %3473 = vmatprep.mubr.msk.f32.mxu1 %vm3860_vm0, %v3859_v1 }
 0x317   : > { %v985_v16 = vadd.f32 %v981_v60, %v978_v15 }
 0x319   : > { %3474 = vmatmul.mubr.msk.f32.gmra.mxu1 %vm715_vm1, %v985_v16 }
 0x31a   : > { %3500 = vmatprep.mubr.msk.f32.mxu1 %vm3860_vm0, %v3859_v1 }
 0x3cd   : > { %v1184_v17 = vpop.f32.mrf.mxu0 }
 0x3ce   : > { %v4280_v30 = vadd.f32 %v3195_v23, %v1184_v17 }
 0x3cf   : > { %v3458_v19 = vpop.f32.mrf.mxu0 }
 0x3d1   : > { %v1263_v20 = vpop.f32.mrf.mxu1 }
 0x3d2   : > { %v4272_v27 = vadd.f32 %v3195_v23, %v1263_v20 }
 0x3d3   : > { %v3469_v21 = vpop.f32.mrf.mxu1 }
 0x3d5   : > { %v1268_v22 = vpop.f32.mrf.mxu1 }
 0x3d6   : > { %v4268_v24 = vadd.f32 %v3195_v23, %v1268_v22 }
 0x3d7   : > { %v3472_v25 = vpop.f32.mrf.mxu1 }
 0x3d8   : > { %1282 = vrot.lane.b32.xlu0 %v4268_v24, %s3863_s27 }
 0x3d9   : > { %v1273_v26 = vpop.f32.mrf.mxu1 }
 0x3da   : > { %v4274_v28 = vadd.f32 %v3195_v23, %v1273_v26 }
 0x3db   : > { %v3475_v29 = vpop.f32.mrf.mxu1 }
 0x3dc   : > { %1280 = vrot.lane.b32.xlu0 %v4272_v27, %s3863_s27  ;;  %1284 = vrot.lane.b32.xlu1 %v4274_v28, %s3863_s27 }
 0x3e0   : > { %1467 = vrot.lane.b32.xlu1 %v4274_v28, %s3865_s19  ;;  %1461 = vrot.lane.b32.xlu0 %v4280_v30, %s3866_s21  ;;  %s3876_s21 = smov 48  }
 0x3e4   : > { %1465 = vrot.lane.b32.xlu1 %v4268_v24, %s3865_s19  ;;  %1646 = vrot.lane.b32.xlu0 %v4268_v24, %s3867_s24 }
 0x3e8   : > { %1463 = vrot.lane.b32.xlu1 %v4272_v27, %s3865_s19  ;;  %1642 = vrot.lane.b32.xlu0 %v4280_v30, %s3868_s18  ;;  %s3875_s19 = smov 52   ;;  %s3878_s18 = smov 108  }
 0x3ec   : > { %1648 = vrot.lane.b32.xlu1 %v4274_v28, %s3867_s24 }
 0x3f0   : > { %1644 = vrot.lane.b32.xlu1 %v4272_v27, %s3867_s24  ;;  %s3877_s24 = smov 76  }
 0x44a   : > { %v1283_v32 = vpop.permute.xlu0 %1282 }
 0x44e   : > { %v1285_v31 = vpop.permute.xlu1 %1284  ;;  %v1281_v34 = vpop.permute.xlu0 %1280 }
 0x44f   : > { %3477 = vmatpush3.xpose.msk.msra.mxu0 %vm621_vm3, %v1285_v31 }
 0x450   : > { %3478 = vmatprep.subr.mxu0 %v3859_v1 }
 0x452   : > { %v1468_v33 = vpop.permute.xlu1 %1467  ;;  %v1462_v37 = vpop.permute.xlu0 %1461 }
 0x453   : > { %3479 = vmatpush3.xpose.msk.msra.mxu0 %vm621_vm3, %v1283_v32  ;;  %3495 = vmatpush3.xpose.msk.msra.mxu1 %vm621_vm3, %v1468_v33 }
 0x454   : > { %3496 = vmatprep.subr.mxu1 %v3859_v1  ;;  %3480 = vmatprep.subr.mxu0 %v3859_v1 }
 0x456   : > { %v1466_v35 = vpop.permute.xlu1 %1465  ;;  %v1647_v40 = vpop.permute.xlu0 %1646 }
 0x457   : > { %3481 = vmatpush3.xpose.msk.msra.mxu0 %vm621_vm3, %v1281_v34  ;;  %3497 = vmatpush3.xpose.msk.msra.mxu1 %vm621_vm3, %v1466_v35 }
 0x458   : > { %3498 = vmatprep.subr.mxu1 %v3859_v1  ;;  %3485 = vmatprep.subr.mxu0 %v3859_v1 }
 0x45a   : > { %v1464_v36 = vpop.permute.xlu1 %1463  ;;  %3483 = vmatmul.mubr.msk.f32.vlgmr.msra.gmra.mxu0 %vm621_vm3, %v4280_v30  ;;  %v1643_v42 = vpop.permute.xlu0 %1642 }
 0x45b   : > { %3499 = vmatpush3.xpose.msk.msra.mxu1 %vm621_vm3, %v1464_v36  ;;  %3491 = vmatprep.mubr.msk.f32.mxu0 %vm3860_vm0, %v3859_v1 }
 0x45c   : > { %3512 = vmatprep.subr.mxu1 %v3859_v1 }
 0x45e   : > { %v1649_v39 = vpop.permute.xlu1 %1648  ;;  %3501 = vmatmul.mubr.msk.f32.vlgmr.msra.gmra.mxu1 %vm621_vm3, %v1462_v37 }
 0x45f   : > { %3513 = vmatpush3.xpose.msk.msra.mxu1 %vm621_vm3, %v1649_v39  ;;  %3518 = vmatprep.mubr.msk.f32.mxu1 %vm3860_vm0, %v3859_v1 }
 0x460   : > { %3514 = vmatprep.subr.mxu1 %v3859_v1 }
 0x462   : > { %v1645_v41 = vpop.permute.xlu1 %1644 }
 0x463   : > { %3515 = vmatpush3.xpose.msk.msra.mxu1 %vm621_vm3, %v1647_v40 }
 0x464   : > { %3516 = vmatprep.subr.mxu1 %v3859_v1 }
 0x467   : > { %3517 = vmatpush3.xpose.msk.msra.mxu1 %vm621_vm3, %v1645_v41 }
 0x468   : > { %3548 = vmatprep.subr.mxu1 %v3859_v1 }
 0x46a   : > { %3519 = vmatmul.mubr.msk.f32.vlgmr.msra.gmra.mxu1 %vm621_vm3, %v1643_v42 }
 0x46b   : > { %3554 = vmatprep.mubr.msk.f32.mxu1 %vm3860_vm0, %v3859_v1 }
 0x51a   : > { %v1361_v43 = vpop.f32.mrf.mxu0 }
 0x51b   : > { %v1365_v44 = vmul.f32 0.5, %v1361_v43 }
 0x51c   : > { %v3484_v45 = vpop.f32.mrf.mxu0 }
 0x51d   : > { %v1367_v46 = vsel %vm1366_vm9, %v1365_v44, -inf }
 0x51e   : > { %1368 = vmax.xlane.f32.xlu1 %v1367_v46  ;;  %v1543_v47 = vpop.f32.mrf.mxu1 }
 0x51f   : > { %v1547_v48 = vmul.f32 0.5, %v1543_v47 }
 0x520   : > { %v3502_v49 = vpop.f32.mrf.mxu1 }
 0x521   : > { %v1548_v50 = vsel %vm1366_vm9, %v1547_v48, -inf }
 0x522   : > { %1549 = vmax.xlane.f32.xlu0 %v1548_v50 }
 0x52a   : > { %v1724_v51 = vpop.f32.mrf.mxu1 }
 0x52b   : > { %v1728_v52 = vmul.f32 0.5, %v1724_v51 }
 0x52c   : > { %v3520_v53 = vpop.f32.mrf.mxu1 }
 0x52d   : > { %v1729_v54 = vsel %vm1366_vm9, %v1728_v52, -inf }
 0x52e   : > { %1730 = vmax.xlane.f32.xlu0 %v1729_v54 }
 0x52f   : > { %1380 = vrot.lane.b32.xlu1 %v4268_v24, %s3862_s20 }
 0x533   : > { %1378 = vrot.lane.b32.xlu1 %v4272_v27, %s3862_s20 }
 0x537   : > { %1561 = vrot.lane.b32.xlu1 %v4268_v24, %s3869_s29 }
 0x53b   : > { %1744 = vrot.lane.b32.xlu1 %v4274_v28, %s3870_s30 }
 0x544   : > { %1382 = vrot.lane.b32.xlu0 %v4274_v28, %s3862_s20 }
 0x548   : > { %1563 = vrot.lane.b32.xlu0 %v4274_v28, %s3869_s29 }
 0x54c   : > { %1559 = vrot.lane.b32.xlu0 %v4272_v27, %s3869_s29  ;;  %s3879_s29 = smov 44  }
 0x5a7   : > { %v1369_v55 = vpop.xlane.xlu1 %1368 }
 0x5a8   : > { %v1370_v56 = vsub.f32 %v1365_v44, %v1369_v55 }
 0x5aa   : > { %v1371_v57 = vmul.f32 1.442695, %v1370_v56 }
 0x5ab   : > { %v1550_v58 = vpop.xlane.xlu0 %1549  ;;  %v1381_v63 = vpop.permute.xlu1 %1380 }
 0x5ac   : > { %3757 = vpow2.f32 %v1371_v57  ;;  %v1551_v59 = vsub.f32 %v1547_v48, %v1550_v58 }
 0x5ae   : > { %v1552_v60 = vmul.f32 1.442695, %v1551_v59 }
 0x5af   : > { %v1379_v7 = vpop.permute.xlu1 %1378 }
 0x5b0   : > { %3759 = vpow2.f32 %v1552_v60 }
 0x5b3   : > { %v1562_v12 = vpop.permute.xlu1 %1561 }
 0x5b7   : > { %v1731_v61 = vpop.xlane.xlu0 %1730  ;;  %v1745_v14 = vpop.permute.xlu1 %1744 }
 0x5b8   : > { %v1732_v8 = vsub.f32 %v1728_v52, %v1731_v61 }
 0x5b9   : > { %v3758_v62 = vpop.eup %3757 }
 0x5ba   : > { %v1373_v0 = vsel %vm1366_vm9, %v3758_v62, 0.0  ;;  %v1733_v9 = vmul.f32 1.442695, %v1732_v8 }
 0x5bb   : > { %1374 = vadd.xlane.f32.xlu1 %v1373_v0  ;;  %v1383_v2 = vpop.permute.xlu0 %1382 }
 0x5bc   : > { %3486 = vmatpush3.msk.msra.mxu0 %vm625_vm2, %v1383_v2  ;;  %3761 = vpow2.f32 %v1733_v9 }
 0x5bd   : > { %v3760_v3 = vpop.eup %3759  ;;  %3487 = vmatprep.subr.mxu0 %v3859_v1 }
 0x5be   : > { %3488 = vmatpush3.msra.mxu0 %v1381_v63  ;;  %v1554_v5 = vsel %vm1366_vm9, %v3760_v3, 0.0 }
 0x5bf   : > { %1555 = vadd.xlane.f32.xlu0 %v1554_v5  ;;  %3489 = vmatprep.subr.mxu0 %v3859_v1  ;;  %v1564_v13 = vpop.permute.xlu0 %1563 }
 0x5c0   : > { %3490 = vmatpush3.msra.mxu0 %v1379_v7 }
 0x5c1   : > { %3503 = vmatprep.subr.mxu0 %v3859_v1 }
 0x5c3   : > { %v1560_v15 = vpop.permute.xlu0 %1559 }
 0x5c9   : > { %v3762_v10 = vpop.eup %3761 }
 0x5ca   : > { %v1735_v11 = vsel %vm1366_vm9, %v3762_v10, 0.0 }
 0x5cc   : > { %1740 = vrot.lane.b32.xlu1 %v4272_v27, %s3870_s30 }
 0x5d0   : > { %1827 = vrot.lane.b32.xlu1 %v4268_v24, %s3871_s1 }
 0x5d5   : > { %1742 = vrot.lane.b32.xlu0 %v4268_v24, %s3870_s30  ;;  %s3880_s30 = smov 72  }
 0x5d9   : > { %1829 = vrot.lane.b32.xlu0 %v4274_v28, %s3871_s1 }
 0x5dd   : > { %2010 = vrot.lane.b32.xlu0 %v4274_v28, %s3872_s22 }
 0x5e1   : > { %2008 = vrot.lane.b32.xlu0 %v4268_v24, %s3872_s22 }
 0x5e5   : > { %2006 = vrot.lane.b32.xlu0 %v4272_v27, %s3872_s22  ;;  %s3882_s22 = smov 40  }
 0x5f4   : > { %1736 = vadd.xlane.f32.xlu1 %v1735_v11 }
 0x605   : > { %1825 = vrot.lane.b32.xlu1 %v4272_v27, %s3871_s1  ;;  %s3881_s1 = smov 104  }
 0x609   : > { %1823 = vrot.lane.b32.xlu1 %v4280_v30, %s3873_s25  ;;  %s3883_s25 = smov 68  }
 0x60d   : > { %2004 = vrot.lane.b32.xlu1 %v4280_v30, %s3874_s26  ;;  %s3884_s26 = smov 100  }
 0x644   : > { %v1375_v16 = vpop.xlane.xlu1 %1374 }
 0x645   : > { %3763 = vrcp.f32 %v1375_v16 }
 0x648   : > { %v1556_v17 = vpop.xlane.xlu0 %1555  ;;  %v1741_v32 = vpop.permute.xlu1 %1740 }
 0x649   : > { %3765 = vrcp.f32 %v1556_v17 }
 0x64c   : > { %v1743_v19 = vpop.permute.xlu0 %1742  ;;  %v1828_v33 = vpop.permute.xlu1 %1827 }
 0x650   : > { %v1830_v20 = vpop.permute.xlu0 %1829 }
 0x652   : > { %v3764_v21 = vpop.eup %3763 }
 0x653   : > { %v1377_v23 = vmul.f32 %v3764_v21, %v3758_v62 }
 0x654   : > { %v2011_v22 = vpop.permute.xlu0 %2010 }
 0x655   : > { %3492 = vmatmul.mubr.msk.f32.vlgmr.msra.gmra.mxu0 %vm1366_vm9, %v1377_v23  ;;  %3549 = vmatpush3.xpose.msk.msra.mxu1 %vm621_vm3, %v2011_v22 }
 0x656   : > { %v3766_v25 = vpop.eup %3765  ;;  %3504 = vmatpush3.msk.msra.mxu0 %vm625_vm2, %v1564_v13  ;;  %3550 = vmatprep.subr.mxu1 %v3859_v1 }
 0x657   : > { %3505 = vmatprep.subr.mxu0 %v3859_v1  ;;  %3509 = vmatprep.mubr.msk.f32.mxu0 %vm3860_vm0, %v3859_v1  ;;  %v1558_v26 = vmul.f32 %v3766_v25, %v3760_v3 }
 0x658   : > { %3506 = vmatpush3.msra.mxu0 %v1562_v12  ;;  %v2009_v29 = vpop.permute.xlu0 %2008 }
 0x659   : > { %3507 = vmatprep.subr.mxu0 %v3859_v1  ;;  %3551 = vmatpush3.xpose.msk.msra.mxu1 %vm621_vm3, %v2009_v29 }
 0x65a   : > { %3508 = vmatpush3.msra.mxu0 %v1560_v15  ;;  %3552 = vmatprep.subr.mxu1 %v3859_v1 }
 0x65b   : > { %3510 = vmatmul.mubr.msk.f32.vlgmr.msra.gmra.mxu0 %vm1366_vm9, %v1558_v26  ;;  %3521 = vmatprep.subr.mxu0 %v3859_v1 }
 0x65c   : > { %3522 = vmatpush3.msk.msra.mxu0 %vm625_vm2, %v1745_v14  ;;  %v2007_v31 = vpop.permute.xlu0 %2006  ;;  %3527 = vmatprep.mubr.msk.f32.mxu0 %vm3860_vm0, %v3859_v1 }
 0x65d   : > { %3523 = vmatprep.subr.mxu0 %v3859_v1  ;;  %3553 = vmatpush3.xpose.msk.msra.mxu1 %vm621_vm3, %v2007_v31 }
 0x65e   : > { %3524 = vmatpush3.msra.mxu0 %v1743_v19  ;;  %3575 = vmatprep.subr.mxu1 %v3859_v1 }
 0x65f   : > { %3525 = vmatprep.subr.mxu0 %v3859_v1 }
 0x660   : > { %3526 = vmatpush3.msra.mxu0 %v1741_v32 }
 0x661   : > { %3530 = vmatprep.subr.mxu0 %v3859_v1 }
 0x67d   : > { %v1737_v34 = vpop.xlane.xlu1 %1736 }
 0x67e   : > { %3767 = vrcp.f32 %v1737_v34 }
 0x681   : > { %v1826_v35 = vpop.permute.xlu1 %1825 }
 0x685   : > { %v1824_v36 = vpop.permute.xlu1 %1823 }
 0x689   : > { %v2005_v37 = vpop.permute.xlu1 %2004 }
 0x68a   : > { %3555 = vmatmul.mubr.msk.f32.vlgmr.msra.gmra.mxu1 %vm621_vm3, %v2005_v37 }
 0x68b   : > { %v3768_v39 = vpop.eup %3767  ;;  %3581 = vmatprep.mubr.msk.f32.mxu1 %vm3860_vm0, %v3859_v1 }
 0x68c   : > { %v1739_v40 = vmul.f32 %v3768_v39, %v3762_v10 }
 0x68e   : > { %3528 = vmatmul.mubr.msk.f32.vlgmr.msra.gmra.mxu0 %vm1366_vm9, %v1739_v40 }
 0x68f   : > { %3531 = vmatpush3.xpose.msk.msra.mxu0 %vm621_vm3, %v1830_v20  ;;  %3536 = vmatprep.mubr.msk.f32.mxu0 %vm3860_vm0, %v3859_v1 }
 0x690   : > { %3532 = vmatprep.subr.mxu0 %v3859_v1 }
 0x693   : > { %3533 = vmatpush3.xpose.msk.msra.mxu0 %vm621_vm3, %v1828_v33 }
 0x694   : > { %3534 = vmatprep.subr.mxu0 %v3859_v1 }
 0x697   : > { %3535 = vmatpush3.xpose.msk.msra.mxu0 %vm621_vm3, %v1826_v35 }
 0x698   : > { %3539 = vmatprep.subr.mxu0 %v3859_v1 }
 0x69a   : > { %3537 = vmatmul.mubr.msk.f32.vlgmr.msra.gmra.mxu0 %vm621_vm3, %v1824_v36 }
 0x69b   : > { %3545 = vmatprep.mubr.msk.f32.mxu0 %vm3860_vm0, %v3859_v1 }
 0x715   : > { %v4386_v41 = vpop.f32.mrf.mxu0 }
 0x717   : > { %v3493_v42 = vpop.f32.mrf.mxu0 }
 0x71b   : > { %v4388_v43 = vpop.f32.mrf.mxu0 }
 0x71d   : > { %v3511_v44 = vpop.f32.mrf.mxu0 }
 0x74a   : > { %v2086_v45 = vpop.f32.mrf.mxu1 }
 0x74b   : > { %v2090_v46 = vmul.f32 0.5, %v2086_v45 }
 0x74c   : > { %v3556_v47 = vpop.f32.mrf.mxu1 }
 0x74d   : > { %v2091_v48 = vsel %vm1366_vm9, %v2090_v46, -inf }
 0x74e   : > { %v4391_v49 = vpop.f32.mrf.mxu0  ;;  %2092 = vmax.xlane.f32.xlu1 %v2091_v48 }
 0x750   : > { %v3529_v50 = vpop.f32.mrf.mxu0 }
 0x75a   : > { %v1905_v51 = vpop.f32.mrf.mxu0 }
 0x75b   : > { %v1909_v52 = vmul.f32 0.5, %v1905_v51 }
 0x75c   : > { %v3538_v53 = vpop.f32.mrf.mxu0 }
 0x75d   : > { %v1910_v54 = vsel %vm1366_vm9, %v1909_v52, -inf }
 0x75e   : > { %1911 = vmax.xlane.f32.xlu0 %v1910_v54 }
 0x75f   : > { %1925 = vrot.lane.b32.xlu1 %v4274_v28, %s3875_s19 }
 0x763   : > { %1921 = vrot.lane.b32.xlu1 %v4272_v27, %s3875_s19 }
 0x767   : > { %2106 = vrot.lane.b32.xlu1 %v4274_v28, %s3876_s21 }
 0x76b   : > { %2102 = vrot.lane.b32.xlu1 %v4272_v27, %s3876_s21 }
 0x76f   : > { %2189 = vrot.lane.b32.xlu1 %v4268_v24, %s3877_s24 }
 0x773   : > { %2185 = vrot.lane.b32.xlu1 %v4280_v30, %s3878_s18  ;;  %s3888_s18 = smov 24  }
 0x777   : > { %2285 = vrot.lane.b32.xlu1 %v4268_v24, %s3879_s29 }
 0x77b   : > { %2372 = vrot.lane.b32.xlu1 %v4274_v28, %s3880_s30 }
 0x7d7   : > { %v2093_v55 = vpop.xlane.xlu1 %2092 }
 0x7d8   : > { %v2094_v56 = vsub.f32 %v2090_v46, %v2093_v55 }
 0x7da   : > { %v2095_v57 = vmul.f32 1.442695, %v2094_v56 }
 0x7db   : > { %v1926_v58 = vpop.permute.xlu1 %1925 }
 0x7dc   : > { %3769 = vpow2.f32 %v2095_v57  ;;  %3540 = vmatpush3.msk.msra.mxu0 %vm625_vm2, %v1926_v58 }
 0x7dd   : > { %3541 = vmatprep.subr.mxu0 %v3859_v1 }
 0x7df   : > { %v1922_v7 = vpop.permute.xlu1 %1921 }
 0x7e3   : > { %v2107_v10 = vpop.permute.xlu1 %2106 }
 0x7e7   : > { %v1912_v61 = vpop.xlane.xlu0 %1911  ;;  %v2103_v14 = vpop.permute.xlu1 %2102 }
 0x7e8   : > { %v1913_v62 = vsub.f32 %v1909_v52, %v1912_v61 }
 0x7e9   : > { %v3770_v59 = vpop.eup %3769 }
 0x7ea   : > { %v2097_v60 = vsel %vm1366_vm9, %v3770_v59, 0.0  ;;  %v1914_v63 = vmul.f32 1.442695, %v1913_v62 }
 0x7eb   : > { %2098 = vadd.xlane.f32.xlu0 %v2097_v60  ;;  %v2190_v17 = vpop.permute.xlu1 %2189 }
 0x7ec   : > { %3771 = vpow2.f32 %v1914_v63 }
 0x7ef   : > { %v2186_v20 = vpop.permute.xlu1 %2185 }
 0x7f3   : > { %v2286_v37 = vpop.permute.xlu1 %2285 }
 0x7f7   : > { %v2373_v47 = vpop.permute.xlu1 %2372 }
 0x7f9   : > { %v3772_v0 = vpop.eup %3771 }
 0x7fa   : > { %v1916_v2 = vsel %vm1366_vm9, %v3772_v0, 0.0 }
 0x801   : > { %1923 = vrot.lane.b32.xlu0 %v4268_v24, %s3875_s19  ;;  %s3885_s19 = smov 36  }
 0x820   : > { %1917 = vadd.xlane.f32.xlu0 %v1916_v2 }
 0x836   : > { %2104 = vrot.lane.b32.xlu0 %v4268_v24, %s3876_s21  ;;  %s3886_s21 = smov 8  }
 0x83a   : > { %2191 = vrot.lane.b32.xlu0 %v4274_v28, %s3877_s24 }
 0x83e   : > { %2187 = vrot.lane.b32.xlu0 %v4272_v27, %s3877_s24  ;;  %s3887_s24 = smov 16  }
 0x874   : > { %v2099_v3 = vpop.xlane.xlu0 %2098 }
 0x878   : > { %v1924_v5 = vpop.permute.xlu0 %1923 }
 0x879   : > { %3542 = vmatpush3.msra.mxu0 %v1924_v5 }
 0x87a   : > { %3543 = vmatprep.subr.mxu0 %v3859_v1 }
 0x87b   : > { %3544 = vmatpush3.msra.mxu0 %v1922_v7 }
 0x87c   : > { %3557 = vmatprep.subr.mxu0 %v3859_v1 }
 0x8a9   : > { %v1918_v8 = vpop.xlane.xlu0 %1917 }
 0x8aa   : > { %3773 = vrcp.f32 %v1918_v8 }
 0x8ab   : > { %3775 = vrcp.f32 %v2099_v3 }
 0x8ad   : > { %v2105_v12 = vpop.permute.xlu0 %2104 }
 0x8b1   : > { %v2192_v16 = vpop.permute.xlu0 %2191 }
 0x8b5   : > { %v2188_v19 = vpop.permute.xlu0 %2187 }
 0x8b7   : > { %v3774_v9 = vpop.eup %3773 }
 0x8b8   : > { %v1920_v11 = vmul.f32 %v3774_v9, %v3772_v0  ;;  %v3776_v13 = vpop.eup %3775 }
 0x8b9   : > { %v2101_v15 = vmul.f32 %v3776_v13, %v3770_v59 }
 0x8ba   : > { %3546 = vmatmul.mubr.msk.f32.vlgmr.msra.gmra.mxu0 %vm1366_vm9, %v1920_v11 }
 0x8bb   : > { %3558 = vmatpush3.msk.msra.mxu0 %vm625_vm2, %v2107_v10  ;;  %3563 = vmatprep.mubr.msk.f32.mxu0 %vm3860_vm0, %v3859_v1 }
 0x8bc   : > { %3559 = vmatprep.subr.mxu0 %v3859_v1 }
 0x8bd   : > { %3560 = vmatpush3.msra.mxu0 %v2105_v12 }
 0x8be   : > { %3561 = vmatprep.subr.mxu0 %v3859_v1 }
 0x8bf   : > { %3562 = vmatpush3.msra.mxu0 %v2103_v14 }
 0x8c0   : > { %3564 = vmatmul.mubr.msk.f32.vlgmr.msra.gmra.mxu0 %vm1366_vm9, %v2101_v15  ;;  %3566 = vmatprep.subr.mxu0 %v3859_v1 }
 0x8c1   : > { %3567 = vmatpush3.xpose.msk.msra.mxu0 %vm621_vm3, %v2192_v16  ;;  %3572 = vmatprep.mubr.msk.f32.mxu0 %vm3860_vm0, %v3859_v1 }
 0x8c2   : > { %3568 = vmatprep.subr.mxu0 %v3859_v1 }
 0x8c5   : > { %3569 = vmatpush3.xpose.msk.msra.mxu0 %vm621_vm3, %v2190_v17 }
 0x8c6   : > { %3570 = vmatprep.subr.mxu0 %v3859_v1 }
 0x8c9   : > { %3571 = vmatpush3.xpose.msk.msra.mxu0 %vm621_vm3, %v2188_v19 }
 0x8ca   : > { %3593 = vmatprep.subr.mxu0 %v3859_v1 }
 0x8cc   : > { %3573 = vmatmul.mubr.msk.f32.vlgmr.msra.gmra.mxu0 %vm621_vm3, %v2186_v20 }
 0x8cd   : > { %3599 = vmatprep.mubr.msk.f32.mxu0 %vm3860_vm0, %v3859_v1 }
 0x97a   : > { %v4433_v21 = vpop.f32.mrf.mxu0 }
 0x97c   : > { %v3547_v23 = vpop.f32.mrf.mxu0 }
 0x980   : > { %v4435_v22 = vpop.f32.mrf.mxu0 }
 0x982   : > { %v3565_v25 = vpop.f32.mrf.mxu0 }
 0x98c   : > { %v2267_v26 = vpop.f32.mrf.mxu0 }
 0x98d   : > { %v2271_v29 = vmul.f32 0.5, %v2267_v26 }
 0x98e   : > { %v3574_v31 = vpop.f32.mrf.mxu0 }
 0x98f   : > { %v2272_v32 = vsel %vm1366_vm9, %v2271_v29, -inf  ;;  %v2768_v31 = vld [vmem:[%s4654_s12] sm:$0xff] }
 0x990   : > { %2273 = vmax.xlane.f32.xlu0 %v2272_v32 }
 0x9a6   : > { %2287 = vrot.lane.b32.xlu0 %v4274_v28, %s3879_s29 }
 0x9aa   : > { %2283 = vrot.lane.b32.xlu0 %v4272_v27, %s3879_s29  ;;  %s3889_s29 = smov 4  }
 0x9ae   : > { %2370 = vrot.lane.b32.xlu0 %v4268_v24, %s3880_s30 }
 0x9b2   : > { %2366 = vrot.lane.b32.xlu0 %v4280_v30, %s3881_s1  ;;  %s3891_s1 = smov 20  }
 0x9b6   : > { %2468 = vrot.lane.b32.xlu0 %v4274_v28, %s3882_s22 }
 0xa19   : > { %v2274_v33 = vpop.xlane.xlu0 %2273 }
 0xa1a   : > { %v2275_v34 = vsub.f32 %v2271_v29, %v2274_v33  ;;  %v2769_v29 = vld [vmem:[%s4654_s12 + $0x8] sm:$0xff] }
 0xa1c   : > { %v2276_v35 = vmul.f32 1.442695, %v2275_v34 }
 0xa1d   : > { %v2288_v36 = vpop.permute.xlu0 %2287 }
 0xa1e   : > { %3777 = vpow2.f32 %v2276_v35  ;;  %3576 = vmatpush3.msk.msra.mxu1 %vm625_vm2, %v2288_v36 }
 0xa1f   : > { %3577 = vmatprep.subr.mxu1 %v3859_v1 }
 0xa20   : > { %3578 = vmatpush3.msra.mxu1 %v2286_v37 }
 0xa21   : > { %3579 = vmatprep.subr.mxu1 %v3859_v1  ;;  %v2284_v39 = vpop.permute.xlu0 %2283 }
 0xa22   : > { %3580 = vmatpush3.msra.mxu1 %v2284_v39 }
 0xa23   : > { %3584 = vmatprep.subr.mxu1 %v3859_v1 }
 0xa25   : > { %v2371_v40 = vpop.permute.xlu0 %2370 }
 0xa29   : > { %v2367_v42 = vpop.permute.xlu0 %2366 }
 0xa2b   : > { %v3778_v44 = vpop.eup %3777 }
 0xa2c   : > { %v2278_v45 = vsel %vm1366_vm9, %v3778_v44, 0.0 }
 0xa2d   : > { %2279 = vadd.xlane.f32.xlu1 %v2278_v45  ;;  %v2469_v46 = vpop.permute.xlu0 %2468 }
 0xa2e   : > { %3594 = vmatpush3.msk.msra.mxu0 %vm625_vm2, %v2469_v46 }
 0xa2f   : > { %3595 = vmatprep.subr.mxu0 %v3859_v1 }
 0xa3e   : > { %2368 = vrot.lane.b32.xlu1 %v4272_v27, %s3880_s30  ;;  %s3890_s30 = smov 12  }
 0xab6   : > { %v2280_v48 = vpop.xlane.xlu1 %2279 }
 0xab7   : > { %3779 = vrcp.f32 %v2280_v48 }
 0xaba   : > { %v2369_v52 = vpop.permute.xlu1 %2368 }
 0xac4   : > { %v3780_v50 = vpop.eup %3779 }
 0xac5   : > { %v2282_v51 = vmul.f32 %v3780_v50, %v3778_v44 }
 0xac7   : > { %3582 = vmatmul.mubr.msk.f32.vlgmr.msra.gmra.mxu1 %vm1366_vm9, %v2282_v51 }
 0xac8   : > { %3585 = vmatpush3.xpose.msk.msra.mxu1 %vm621_vm3, %v2373_v47  ;;  %3590 = vmatprep.mubr.msk.f32.mxu1 %vm3860_vm0, %v3859_v1 }
 0xac9   : > { %3586 = vmatprep.subr.mxu1 %v3859_v1 }
 0xacc   : > { %3587 = vmatpush3.xpose.msk.msra.mxu1 %vm621_vm3, %v2371_v40 }
 0xacd   : > { %3588 = vmatprep.subr.mxu1 %v3859_v1 }
 0xad0   : > { %3589 = vmatpush3.xpose.msk.msra.mxu1 %vm621_vm3, %v2369_v52 }
 0xad1   : > { %3611 = vmatprep.subr.mxu1 %v3859_v1 }
 0xad3   : > { %3591 = vmatmul.mubr.msk.f32.vlgmr.msra.gmra.mxu1 %vm621_vm3, %v2367_v42 }
 0xad4   : > { %3617 = vmatprep.mubr.msk.f32.mxu1 %vm3860_vm0, %v3859_v1 }
 0xb87   : > { %v4468_v53 = vpop.f32.mrf.mxu1 }
 0xb89   : > { %v3583_v54 = vpop.f32.mrf.mxu1 }
 0xb93   : > { %v2448_v55 = vpop.f32.mrf.mxu1 }
 0xb94   : > { %v2452_v56 = vmul.f32 0.5, %v2448_v55 }
 0xb95   : > { %v3592_v57 = vpop.f32.mrf.mxu1 }
 0xb96   : > { %v2453_v58 = vsel %vm1366_vm9, %v2452_v56, -inf  ;;  %v699_v57 = vadd.f32 %v4186_v4, %v4172_v38  ;;  %v2879_v38 = vld [vmem:[%s4656_s14 + $0x18] sm:$0xff]  ;;  %v2878_v4 = vld [vmem:[%s4656_s14 + $0x10] sm:$0xff] }
 0xb97   : > { %2454 = vmax.xlane.f32.xlu1 %v2453_v58 }
 0xb98   : > { %v4541_v58 = vrot.slane %v699_v57, %v4194_v18  ;;  %v2877_v18 = vld [vmem:[%s4656_s14 + $0x8] sm:$0xff] }
 0xba8   : > { %2466 = vrot.lane.b32.xlu1 %v4268_v24, %s3882_s22 }
 0xbac   : > { %2464 = vrot.lane.b32.xlu1 %v4272_v27, %s3882_s22  ;;  %s4683_s22 = sld [smem:[#allocation14_spill]] }
 0xbb0   : > { %2551 = vrot.lane.b32.xlu1 %v4268_v24, %s3883_s25 }
 0xbb4   : > { %2547 = vrot.lane.b32.xlu1 %v4280_v30, %s3884_s26 }
 0xc20   : > { %v2455_v59 = vpop.xlane.xlu1 %2454 }
 0xc21   : > { %v2456_v60 = vsub.f32 %v2452_v56, %v2455_v59 }
 0xc23   : > { %v2457_v61 = vmul.f32 1.442695, %v2456_v60 }
 0xc24   : > { %v2467_v62 = vpop.permute.xlu1 %2466 }
 0xc25   : > { %3781 = vpow2.f32 %v2457_v61  ;;  %3596 = vmatpush3.msra.mxu0 %v2467_v62 }
 0xc26   : > { %3597 = vmatprep.subr.mxu0 %v3859_v1 }
 0xc28   : > { %v2465_v63 = vpop.permute.xlu1 %2464 }
 0xc29   : > { %3598 = vmatpush3.msra.mxu0 %v2465_v63  ;;  %v2876_v63 = vld [vmem:[%s4656_s14] sm:$0xff] }
 0xc2a   : > { %3602 = vmatprep.subr.mxu0 %v3859_v1 }
 0xc2c   : > { %v2552_v8 = vpop.permute.xlu1 %2551 }
 0xc30   : > { %v2548_v10 = vpop.permute.xlu1 %2547 }
 0xc32   : > { %v3782_v0 = vpop.eup %3781 }
 0xc33   : > { %v2459_v2 = vsel %vm1366_vm9, %v3782_v0, 0.0 }
 0xc34   : > { %2460 = vadd.xlane.f32.xlu0 %v2459_v2 }
 0xc4a   : > { %2553 = vrot.lane.b32.xlu0 %v4274_v28, %s3883_s25 }
 0xc4e   : > { %2549 = vrot.lane.b32.xlu0 %v4272_v27, %s3883_s25 }
 0xcbd   : > { %v2461_v30 = vpop.xlane.xlu0 %2460 }
 0xcbe   : > { %3783 = vrcp.f32 %v2461_v30 }
 0xcc1   : > { %v2554_v7 = vpop.permute.xlu0 %2553 }
 0xcc5   : > { %v2550_v9 = vpop.permute.xlu0 %2549 }
 0xccb   : > { %v3784_v3 = vpop.eup %3783 }
 0xccc   : > { %v2463_v5 = vmul.f32 %v3784_v3, %v3782_v0 }
 0xcce   : > { %3600 = vmatmul.mubr.msk.f32.vlgmr.msra.gmra.mxu0 %vm1366_vm9, %v2463_v5 }
 0xccf   : > { %3603 = vmatpush3.xpose.msk.msra.mxu0 %vm621_vm3, %v2554_v7  ;;  %3608 = vmatprep.mubr.msk.f32.mxu0 %vm3860_vm0, %v3859_v1 }
 0xcd0   : > { %3604 = vmatprep.subr.mxu0 %v3859_v1 }
 0xcd3   : > { %3605 = vmatpush3.xpose.msk.msra.mxu0 %vm621_vm3, %v2552_v8 }
 0xcd4   : > { %3606 = vmatprep.subr.mxu0 %v3859_v1 }
 0xcd7   : > { %3607 = vmatpush3.xpose.msk.msra.mxu0 %vm621_vm3, %v2550_v9 }
 0xcd8   : > { %3631 = vmatprep.subr.mxu0 %v3859_v1 }
 0xcda   : > { %3609 = vmatmul.mubr.msk.f32.vlgmr.msra.gmra.mxu0 %vm621_vm3, %v2548_v10  ;;  %v2974_v10 = vld [vmem:[%s4658_s16 + $0x38] sm:$0xff] }
 0xcdb   : > { %3639 = vmatprep.mubr.msk.f32.mxu0 %vm3860_vm0, %v3859_v1  ;;  %3632 = vmatpush3.msra.mxu0 %v2879_v38 }
 0xcdc   : > { %3633 = vmatprep.subr.mxu0 %v3859_v1 }
 0xcdd   : > { %3634 = vmatpush3.msra.mxu0 %v2878_v4 }
 0xcde   : > { %3635 = vmatprep.subr.mxu0 %v3859_v1 }
 0xcdf   : > { %3636 = vmatpush3.msra.mxu0 %v2877_v18 }
 0xce0   : > { %3637 = vmatprep.subr.mxu0 %v3859_v1 }
 0xce1   : > { %3638 = vmatpush3.msra.mxu0 %v2876_v63 }
 0xd8e   : > { %v2543_v11 = vpop.f32.mrf.mxu0 }
 0xd90   : > { %v3601_v12 = vpop.f32.mrf.mxu0 }
 0xd91   : > { %v2972_v12 = vld [vmem:[%s4658_s16 + $0x28] sm:$0xff] }
 0xd9a   : > { %v2629_v13 = vpop.f32.mrf.mxu0 }
 0xd9b   : > { %v2633_v14 = vmul.f32 0.5, %v2629_v13  ;;  %v2971_v13 = vld [vmem:[%s4658_s16 + $0x20] sm:$0xff] }
 0xd9c   : > { %v3610_v15 = vpop.f32.mrf.mxu0 }
 0xd9d   : > { %v2634_v16 = vsel %vm1366_vm9, %v2633_v14, -inf  ;;  %v2969_v15 = vld [vmem:[%s4658_s16 + $0x10] sm:$0xff] }
 0xd9e   : > { %2635 = vmax.xlane.f32.xlu0 %v2634_v16  ;;  %v2968_v16 = vld [vmem:[%s4658_s16 + $0x8] sm:$0xff] }
 0xdb4   : > { %2649 = vrot.lane.b32.xlu0 %v4274_v28, %s3885_s19 }
 0xdb8   : > { %2645 = vrot.lane.b32.xlu0 %v4272_v27, %s3885_s19 }
 0xdbc   : > { %2733 = vrot.lane.b32.xlu0 %v4391_v49, %s3886_s21 }
 0xdc0   : > { %2741 = vrot.lane.b32.xlu0 %v4435_v22, %s3887_s24  ;;  %s3256_s24 = sshll.u32 %s4010_s0, 7 }
 0xdc4   : > { %2749 = vrot.lane.b32.xlu0 %v2543_v11, %s3888_s18  ;;  %v2973_v11 = vld [vmem:[%s4658_s16 + $0x30] sm:$0xff] }
 0xe27   : > { %v2636_v17 = vpop.xlane.xlu0 %2635 }
 0xe28   : > { %v2637_v19 = vsub.f32 %v2633_v14, %v2636_v17  ;;  %v2970_v14 = vld [vmem:[%s4658_s16 + $0x18] sm:$0xff]  ;;  %v2967_v17 = vld [vmem:[%s4658_s16] sm:$0xff] }
 0xe2a   : > { %v2638_v20 = vmul.f32 1.442695, %v2637_v19  ;;  %v3250_v19 = vld [vmem:[%s4657_s15] ss:$0 sm:$0xff] }
 0xe2b   : > { %v2650_v23 = vpop.permute.xlu0 %2649 }
 0xe2c   : > { %3785 = vpow2.f32 %v2638_v20  ;;  %3612 = vmatpush3.msk.msra.mxu1 %vm625_vm2, %v2650_v23 }
 0xe2d   : > { %3613 = vmatprep.subr.mxu1 %v3859_v1 }
 0xe2f   : > { %v2646_v25 = vpop.permute.xlu0 %2645 }
 0xe33   : > { %v2734_v35 = vpop.permute.xlu0 %2733 }
 0xe37   : > { %v2742_v40 = vpop.permute.xlu0 %2741 }
 0xe39   : > { %v3786_v28 = vpop.eup %3785 }
 0xe3a   : > { %v2640_v27 = vsel %vm1366_vm9, %v3786_v28, 0.0 }
 0xe3b   : > { %2641 = vadd.xlane.f32.xlu1 %v2640_v27  ;;  %v2750_v47 = vpop.permute.xlu0 %2749 }
 0xe4c   : > { %2647 = vrot.lane.b32.xlu1 %v4268_v24, %s3885_s19  ;;  %s3893_s19 = smov [#allocation2]  }
 0xe4d   : > { %s3801_s0 = sshll.u32 %s3893_s19, 4  ;;  %s3802_s0 = int_to_ptr.vmem [resolvable:$false] %s3801_s0 }
 0xe4e   : > { %s3803_s21 = scalar_lea.vmem %s3802_s0, 256 }
 0xe50   : > { %2729 = vrot.lane.b32.xlu1 %v4388_v43, %s3889_s29  ;;  %v2771_v43 = vld [vmem:[%s4654_s12 + $0x18] sm:$0xff] }
 0xe54   : > { %2737 = vrot.lane.b32.xlu1 %v4433_v21, %s3890_s30  ;;  %v2770_v21 = vld [vmem:[%s4654_s12 + $0x10] sm:$0xff]  ;;  %s3892_s30 = smov 28  }
 0xe58   : > { %2745 = vrot.lane.b32.xlu1 %v4468_v53, %s3891_s1 }
 0xec4   : > { %v2642_v49 = vpop.xlane.xlu1 %2641 }
 0xec5   : > { %3787 = vrcp.f32 %v2642_v49 }
 0xec8   : > { %v2648_v22 = vpop.permute.xlu1 %2647 }
 0xec9   : > { %3614 = vmatpush3.msra.mxu1 %v2648_v22 }
 0xeca   : > { %3615 = vmatprep.subr.mxu1 %v3859_v1 }
 0xecb   : > { %3616 = vmatpush3.msra.mxu1 %v2646_v25 }
 0xecc   : > { %3620 = vmatprep.subr.mxu1 %v3859_v1  ;;  %v2730_v34 = vpop.permute.xlu1 %2729 }
 0xecd   : > { %v2756_v37 = vsel %vm621_vm3, %v4386_v41, %v2730_v34  ;;  %v3248_v41 = vld [vmem:[%s4655_s13] ss:$0 sm:$0xff] }
 0xece   : > { %v2758_v39 = vsel %vm2757_vm10, %v2756_v37, %v2734_v35 }
 0xed0   : > { %v2738_v36 = vpop.permute.xlu1 %2737 }
 0xed1   : > { %v2760_v42 = vsel %vm2759_vm11, %v2758_v39, %v2738_v36 }
 0xed2   : > { %v3788_v24 = vpop.eup %3787  ;;  %v2762_v45 = vsel %vm2761_vm12, %v2760_v42, %v2742_v40 }
 0xed3   : > { %v2644_v26 = vmul.f32 %v3788_v24, %v3786_v28 }
 0xed4   : > { %v2746_v44 = vpop.permute.xlu1 %2745 }
 0xed5   : > { %3618 = vmatmul.mubr.msk.f32.vlgmr.msra.gmra.mxu1 %vm1366_vm9, %v2644_v26  ;;  %v2763_v46 = vsel %vm1366_vm9, %v2762_v45, %v2746_v44 }
 0xed6   : > { %3628 = vmatprep.mubr.msk.f32.mxu1 %vm3860_vm0, %v3859_v1  ;;  %3621 = vmatpush3.msra.mxu1 %v2771_v43  ;;  %v2765_v50 = vsel %vm2764_vm13, %v2763_v46, %v2750_v47 }
 0xed7   : > { %3622 = vmatprep.subr.mxu1 %v3859_v1 }
 0xed8   : > { %3623 = vmatpush3.msra.mxu1 %v2770_v21 }
 0xed9   : > { %3624 = vmatprep.subr.mxu1 %v3859_v1 }
 0xeda   : > { %3625 = vmatpush3.msra.mxu1 %v2769_v29 }
 0xedb   : > { %3626 = vmatprep.subr.mxu1 %v3859_v1 }
 0xedc   : > { %3627 = vmatpush3.msra.mxu1 %v2768_v31 }
 0xedd   : > { %3642 = vmatprep.subr.mxu1 %v3859_v1 }
 0xf95   : > { %v2724_v32 = vpop.f32.mrf.mxu1 }
 0xf96   : > { %2753 = vrot.lane.b32.xlu1 %v2724_v32, %s3892_s30 }
 0xf97   : > { %v3619_v33 = vpop.f32.mrf.mxu1 }
0x1008   : > { %v2754_v48 = vpop.permute.xlu1 %2753 }
0x1009   : > { %v2767_v51 = vsel %vm2766_vm14, %v2765_v50, %v2754_v48 }
0x100a   : > { %3629 = vmatmul.mubr.msk.f32.vlgmr.msra.gmra.mxu1 %vm715_vm1, %v2767_v51 }
0x100b   : > { %3658 = vmatprep.mubr.msk.f32.mxu1 %vm3860_vm0, %v3859_v1  ;;  %3643 = vmatpush3.msra.mxu1 %v2974_v10 }
0x100c   : > { %3644 = vmatprep.subr.mxu1 %v3859_v1 }
0x100d   : > { %3645 = vmatpush3.msra.mxu1 %v2973_v11 }
0x100e   : > { %3646 = vmatprep.subr.mxu1 %v3859_v1 }
0x100f   : > { %3647 = vmatpush3.msra.mxu1 %v2972_v12 }
0x1010   : > { %3648 = vmatprep.subr.mxu1 %v3859_v1 }
0x1011   : > { %3649 = vmatpush3.msra.mxu1 %v2971_v13 }
0x1012   : > { %3650 = vmatprep.subr.mxu1 %v3859_v1 }
0x1013   : > { %3651 = vmatpush3.msra.mxu1 %v2970_v14 }
0x1014   : > { %3652 = vmatprep.subr.mxu1 %v3859_v1 }
0x1015   : > { %3653 = vmatpush3.msra.mxu1 %v2969_v15 }
0x1016   : > { %3654 = vmatprep.subr.mxu1 %v3859_v1 }
0x1017   : > { %3655 = vmatpush3.msra.mxu1 %v2968_v16 }
0x1018   : > { %3656 = vmatprep.subr.mxu1 %v3859_v1  ;;  %v3253_v1 = vld [vmem:[%s4659_s17] ss:$0 sm:$0xff] }
0x1019   : > { %3657 = vmatpush3.msra.mxu1 %v2967_v17 }
0x10ca   : > { %v2848_v52 = vpop.f32.mrf.mxu1 }
0x10cb   : > { %v2849_v53 = vadd.f32 %v3248_v41, %v2848_v52 }
0x10cc   : > { %v3630_v54 = vpop.f32.mrf.mxu1 }
0x10cd   : > { %v2852_v55 = vadd.f32 %v2849_v53, %v4245_v6 }
0x10cf   : > { %v2853_v56 = vsel %vm715_vm1, %v2852_v55, 0.0 }
0x10d0   : > { %2854 = vadd.xlane.f32.xlu0 %v2853_v56 }
0x10e6   : > { %2872 = vrot.lane.b32.xlu0 %v4541_v58, %s3863_s27  ;;  %s590_s27 = sand.u32 1, %s3849_s28  }
0x10e7   : > { %s3078_s25 = scalar_lea.sflag [#allocation3], %s590_s27 }
0x10ea   : > { %3072 = vrot.lane.b32.xlu0 %v4541_v58, %s3864_s23  ;;  %s3175_s23 = sshll.u32 %s590_s27, 3 }
0x10eb   : > { %s592_s18 = scalar_lea.vmem [#allocation2], %s3175_s23 }
0x10ec   : > { %s3091_s29 = sshll.u32 %s592_s18, 4  ;;  %s3092_s29 = int_to_ptr.vmem [resolvable:$true] %s3091_s29 }
0x10ed   : > { %s3797_s26 = scalar_lea.vmem %s3092_s29, 128  ;;  %p3804_p0 = scmp.lt.s32.totalorder %s3092_s29, %s3802_s0 }
0x10ee   : > { %p3798_p11 = scmp.ne.s32.totalorder %s3092_s29, %s3797_s26  ;;  %p3805_p1 = scmp.lt.s32.totalorder %s3803_s21, %s3797_s26 }
0x10f0   : > { %p3799_p12 = pnand %p3798_p11, %p4027_p5  ;;  %p3806_p2 = por %p3805_p1, %p3804_p0 }
0x10f2   : > { %p3800_p13 = pneg %p3799_p12 }
0x10f4   : > { %p3807_p3 = pnand %p3806_p2, %p3800_p13 }
0x1159   : > { %v2855_v59 = vpop.xlane.xlu0 %2854 }
0x115a   : > { %v2856_v60 = vmul.f32 0.03125, %v2855_v59 }
0x115c   : > { %v2857_v61 = vsub.f32 %v2852_v55, %v2856_v60 }
0x115d   : > { %v2873_v8 = vpop.permute.xlu0 %2872 }
0x115e   : > { %v2858_v62 = vmul.f32 %v2857_v61, %v2857_v61 }
0x1160   : > { %v2859_v6 = vsel %vm715_vm1, %v2858_v62, 0.0 }
0x1161   : > { %2860 = vadd.xlane.f32.xlu1 %v2859_v6  ;;  %v3073_v46 = vpop.permute.xlu0 %3072 }
0x11ea   : > { %v2861_v0 = vpop.xlane.xlu1 %2860 }
0x11eb   : > { %v2862_v2 = vmul.f32 0.03125, %v2861_v0 }
0x11ed   : > { %v2863_v30 = vadd.f32 1e-06, %v2862_v2 }
0x11ef   : > { %3789 = vrsqrt.f32 %v2863_v30 }
0x11fc   : > { %v3790_v3 = vpop.eup %3789 }
0x11fd   : > { %v2865_v5 = vmul.f32 %v3790_v3, %v2857_v61 }
0x11ff   : > { %v2870_v7 = vmul.f32 %v4541_v58, %v2865_v5 }
0x1201   : > { %v2875_v9 = vadd.f32 %v2873_v8, %v2870_v7 }
0x1203   : > { %3640 = vmatmul.mubr.msk.f32.vlgmr.msra.gmra.mxu0 %vm715_vm1, %v2875_v9 }
0x12c3   : > { %v2956_v20 = vpop.f32.mrf.mxu0 }
0x12c4   : > { %v2957_v23 = vadd.f32 %v3250_v19, %v2956_v20 }
0x12c5   : > { %v3641_v28 = vpop.f32.mrf.mxu0 }
0x12c6   : > { %v3252_v27 = vmul.f32 -1.442695, %v2957_v23 }
0x12c8   : > { %3791 = vpow2.f32 %v3252_v27 }
0x12d5   : > { %v3792_v49 = vpop.eup %3791 }
0x12d6   : > { %v2963_v22 = vadd.f32 1.0, %v3792_v49 }
0x12d8   : > { %3793 = vrcp.f32 %v2963_v22 }
0x12e5   : > { %v3794_v25 = vpop.eup %3793 }
0x12e6   : > { %v2966_v24 = vmul.f32 %v3794_v25, %v2957_v23 }
0x12e8   : > { %3659 = vmatmul.mubr.msk.f32.vlgmr.msra.gmra.mxu1 %vm841_vm7, %v2966_v24 }
0x13a8   : > { %v3051_v26 = vpop.f32.mrf.mxu1 }
0x13a9   : > { %v3052_v43 = vadd.f32 %v3253_v1, %v3051_v26 }
0x13aa   : > { %v3660_v21 = vpop.f32.mrf.mxu1 }
0x13ab   : > { %v3055_v29 = vsel %vm715_vm1, %v3052_v43, 0.0 }
0x13ac   : > { %3056 = vadd.xlane.f32.xlu1 %v3055_v29 }
0x1435   : > { %v3057_v31 = vpop.xlane.xlu1 %3056 }
0x1436   : > { %v3058_v32 = vmul.f32 0.03125, %v3057_v31 }
0x1438   : > { %v3059_v33 = vsub.f32 %v3052_v43, %v3058_v32 }
0x143a   : > { %v3060_v34 = vmul.f32 %v3059_v33, %v3059_v33 }
0x143c   : > { %v3061_v35 = vsel %vm715_vm1, %v3060_v34, 0.0 }
0x143d   : > { %3062 = vadd.xlane.f32.xlu1 %v3061_v35 }
0x144e   : > { %3068 = vrot.lane.b32.xlu1 %v4541_v58, %s3862_s20  ;;  %s3089_s20 = scalar_lea.hbm %s4683_s22, %s3256_s24 }
0x14c6   : > { %v3063_v36 = vpop.xlane.xlu1 %3062 }
0x14c7   : > { %v3064_v37 = vmul.f32 0.03125, %v3063_v36 }
0x14c9   : > { %v3065_v39 = vadd.f32 1e-06, %v3064_v37 }
0x14ca   : > { %v3069_v44 = vpop.permute.xlu1 %3068 }
0x14cb   : > { %3795 = vrsqrt.f32 %v3065_v39 }
0x14d8   : > { %v3796_v40 = vpop.eup %3795 }
0x14d9   : > { %v3067_v42 = vmul.f32 %v3796_v40, %v3059_v33 }
0x14db   : > { %v3071_v45 = vmul.f32 %v3069_v44, %v3067_v42 }
0x14dd   : > { %v3075_v47 = vadd.f32 %v3073_v46, %v3071_v45 }
0x14df   : > { %3076 = vst.msk [vmem:[%s592_s18] sm:$0xff] %vm715_vm1, %v3075_v47 }
0x14e0   : > { %3810 = shalt.err (!%p3807_p3)
}
0x14e1   : > { %s3811_s23 = scalar_lea.hbm %s3089_s20, 128  ;;  %s3815_s18 = scalar_lea.hbm %s4683_s22, 256 }
0x14e2   : > { %p3812_p4 = scmp.ne.s32.totalorder %s3089_s20, %s3811_s23  ;;  %p3816_p9 = scmp.lt.s32.totalorder %s3089_s20, %s4683_s22 }
0x14e3   : > { %p3817_p10 = scmp.lt.s32.totalorder %s3815_s18, %s3811_s23 }
0x14e4   : > { %p3813_p7 = pnand %p3812_p4, %p4027_p5 }
0x14e5   : > { %p3818_p11 = por %p3817_p10, %p3816_p9 }
0x14e6   : > { %p3814_p8 = pneg %p3813_p7 }
0x14e8   : > { %p3819_p12 = pnand %p3818_p11, %p3814_p8 }
0x14ea   : > { %3822 = shalt.err (!%p3819_p12)
}
0x14eb   : > { %3662 = dma.vmem_to_hbm [thread:$0]  (%p4027_p5), %s3092_s29, 128, %s3089_s20, %s3078_s25  }
0x14ec PF: > { %s4684_s26 = sld [smem:[#allocation7_spill]] }
0x14ed   : > { %s4685_s19 = sld [smem:[#allocation5_spill]] }
0x14f2   : > { %p3668_p13 = scmp.ge.s32.totalorder %s4684_s26, 2 }
0x14f3   : > { %s3103_s21 = sand.u32 1, %s4685_s19  }
0x14f4   : > { %p3665_p0 = pnand %p3668_p13, %p4031_p6  ;;  %s3104_s27 = scalar_lea.sflag [#allocation3], %s3103_s21 }
0x14f6   : > { %p3666_p1 = pneg %p3665_p0 }
0x14f8   : > { %3840 = dma.done.wait (%p3666_p1), %s3104_s27, 128  }
0x14f9   : > { %3842 = vsyncadd (%p3666_p1), %s3104_s27, 4294967168  ;;  %s4687_s30 = sld [smem:[#allocation8_spill]]  ;;  %s4690_s27 = smov %s3849_s28 }
0x14fa   : > { %s4688_s23 = sld [smem:[#allocation6_spill]] }
0x14fb   : > { %s4689_s29 = sld [smem:[#allocation9_spill]] }
0x14ff   : > { %p28_p2 = scmp.ge.s32.totalorder %s4687_s30, 4  }
0x1500   : > { %s4691_s28 = smov %s4688_s23 }
0x1501   :  { %30 = sbr.rel (!%p28_p2) target bundleno = 8 (0x8), region = 133 }
0x1506   :  { %3109 = vsyncpa [#allocation3], 1 }
0x1507   :  { %3111 = vsyncpa [#allocation3 + $0x1], 1 }

</bundles_post_ra>
